<compile_context>
chip_gen: v5e
topology: v5e:2x2
jax: 0.10.0
libtpu: 0.0.40
codegen_flags: <defaults>
</compile_context>

<pallas_src>
import functools
import numpy as np
import jax
import jax.numpy as jnp
from jax import lax
from jax.experimental import pallas as pl
from jax.experimental.pallas import tpu as pltpu

PRELU_ALPHA = 0.25  # nn.PReLU() default; not re-initialised by modeler.weights_init


# ----------------------------- fused Pallas kernel ----------------------------

def _modeler_kernel(seq12T_ref, adjbdT_ref, gcn_wT_ref, gcn_b_ref,
                    wsc_ref, att_yb_ref,
                    we_ref, wiT_ref, lfwT_ref, lfb_ref, wcfbT_ref,
                    lcwT_ref, lcb_ref, lcf_topT_ref, lcfb_ref, wjT_ref, bilb_ref,
                    o_ref, *, alpha):
    """Entire modeler forward.  Working layout is transposed & lane-dense:
       nodes of view1|view2 live side-by-side on the 2N(=128)-lane axis."""
    R = adjbdT_ref.shape[0]
    H = we_ref.shape[0]
    N2 = seq12T_ref.shape[1]          # 2N lanes
    N = N2 // 2
    f32 = jnp.float32
    bf16 = jnp.bfloat16

    seq12T = seq12T_ref[...]          # (FT, 2N) bf16

    # ------------- phase 1: GCN for all R relations & both views -------------
    # One MXU matmul for every relation's feature transform: (R*H,FT)@(FT,2N).
    fts_all = jnp.dot(gcn_wT_ref[...], seq12T, preferred_element_type=f32)   # (R*H, 2N)
    h_list = []
    for r in range(R):                                        # static unroll, R tiny
        fts_r = fts_all[r * H:(r + 1) * H, :].astype(bf16)    # (H, 2N) tile-aligned slice
        # block-diagonal adjacency -> one K=2N lane-dense matmul covers both views
        h_r = jnp.dot(fts_r, adjbdT_ref[r], preferred_element_type=f32)      # (H, 2N)
        h_r = h_r + gcn_b_ref[r * H:(r + 1) * H, :]
        h_list.append(jnp.where(h_r >= 0.0, h_r, alpha * h_r))               # PReLU

    # ------------- phase 2: attention combine (both views at once) -----------
    h_flat = jnp.concatenate(h_list, axis=0)                                  # (R*H, 2N)
    # scores for all relations in one MXU matmul (block-diagonal folded W_r@y_w_r)
    s = jnp.dot(wsc_ref[...], h_flat.astype(bf16),
                preferred_element_type=f32) + att_yb_ref[...]                 # (R, 2N)
    s = jnp.tanh(s)
    s = s - jnp.max(s, axis=0, keepdims=True)
    e = jnp.exp(s)
    p = e / jnp.sum(e, axis=0, keepdims=True)                                 # softmax over r
    h_comb = p[0:1, :] * h_list[0]
    for r in range(1, R):
        h_comb = h_comb + p[r:r + 1, :] * h_list[r]                           # (H, 2N)

    # ------------- phase 3: relation-invariant discriminator precomputes -----
    tcat = jnp.dot(wiT_ref[...], seq12T, preferred_element_type=f32)          # (H, 2N)
    fcat = jnp.tanh(jnp.dot(lfwT_ref[...], seq12T, preferred_element_type=f32)
                    + lfb_ref[...])                                           # (H, 2N)
    fcfcat = jnp.dot(wcfbT_ref[...], fcat.astype(bf16),
                     preferred_element_type=f32)                              # (H, 2N)

    b_e = bilb_ref[0:1, :]
    b_i = bilb_ref[1:2, :]
    b_j = bilb_ref[2:3, :]
    lane = lax.broadcasted_iota(jnp.int32, (H, N2), 1)
    first_half = lane < N

    # ------------- phase 4: discriminator, R relation passes + fusion --------
    out_rows = []
    for h_g in h_list + [h_comb]:                                             # G = R+1 passes
        # [h_pl | h_pl] via XLU roll + select (no lane concat / relayout copy)
        hpl2 = jnp.where(first_half, h_g, pltpu.roll(h_g, N, axis=1))         # (H, 2N)
        # summary c = mean over nodes of h_pl (== mean of hpl2 over all 2N lanes)
        c = jnp.sum(hpl2, axis=-1, keepdims=True) * (1.0 / (2 * N))           # (H, 1)

        # extrinsic: h^T W_e c + b_e   (matvec form of the bilinear)
        wc = jnp.dot(we_ref[...], c, preferred_element_type=f32)              # (H, 1)
        logit_e = jnp.sum(h_g * wc, axis=0, keepdims=True) + b_e              # (1, 2N)

        # intrinsic: rowwise <seq@W_i, h_pl> + b_i (first stage hoisted to tcat)
        logit_i = jnp.sum(tcat * hpl2, axis=0, keepdims=True) + b_i           # (1, 2N)

        # joint: cf = tanh(c_j@W_cf_top + f_j@W_cf_bot + b_cf); <cf@W_j, h_pl> + b_j
        cj = jnp.tanh(jnp.dot(lcwT_ref[...], c, preferred_element_type=f32)
                      + lcb_ref[...])                                         # (H, 1)
        ccf = jnp.dot(lcf_topT_ref[...], cj, preferred_element_type=f32)      # (H, 1)
        cf = jnp.tanh(ccf + fcfcat + lcfb_ref[...])                           # (H, 2N)
        a = jnp.dot(wjT_ref[...], cf.astype(bf16),
                    preferred_element_type=f32)                               # (H, 2N)
        logit_j = jnp.sum(a * hpl2, axis=0, keepdims=True) + b_j              # (1, 2N)

        out_rows.append(jnp.concatenate([logit_e, logit_i, logit_j], axis=0))  # (3, 2N)

    o_ref[...] = jnp.stack(out_rows, axis=0)                                  # (R+1, 3, 2N)


# ----------------------------- parameters ------------------------------------

def xavier_uniform(key, shape, fan_in, fan_out):
    limit = float(np.sqrt(6.0 / (fan_in + fan_out)))
    return jax.random.uniform(key, shape, jnp.float32, -limit, limit)


def init_params(key, ft_size, hid_units, n_networks):
    keys = iter(jax.random.split(key, 64))
    params = {"gcn": [], "w": [], "y": []}
    for _ in range(n_networks):
        params["gcn"].append({
            "w": xavier_uniform(next(keys), (ft_size, hid_units), ft_size, hid_units),
            "b": jnp.zeros((hid_units,), jnp.float32),
        })
        params["w"].append(
            xavier_uniform(next(keys), (hid_units, hid_units), hid_units, hid_units))
        params["y"].append({
            "w": xavier_uniform(next(keys), (hid_units, 1), hid_units, 1),
            "b": jnp.zeros((1,), jnp.float32),
        })
    bb = 1.0 / np.sqrt(hid_units)   # nn.Bilinear default bias init range
    params["disc"] = {
        "W_e": xavier_uniform(next(keys), (hid_units, hid_units), hid_units, hid_units),
        "b_e": jax.random.uniform(next(keys), (), jnp.float32, -bb, bb),
        "W_i": xavier_uniform(next(keys), (ft_size, hid_units), ft_size, hid_units),
        "b_i": jax.random.uniform(next(keys), (), jnp.float32, -bb, bb),
        "W_j": xavier_uniform(next(keys), (hid_units, hid_units), hid_units, hid_units),
        "b_j": jax.random.uniform(next(keys), (), jnp.float32, -bb, bb),
        "lin_c_w": xavier_uniform(next(keys), (hid_units, hid_units), hid_units, hid_units),
        "lin_c_b": jnp.zeros((hid_units,), jnp.float32),
        "lin_f_w": xavier_uniform(next(keys), (ft_size, hid_units), ft_size, hid_units),
        "lin_f_b": jnp.zeros((hid_units,), jnp.float32),
        "lin_cf_w": xavier_uniform(next(keys), (2 * hid_units, hid_units),
                                   2 * hid_units, hid_units),
        "lin_cf_b": jnp.zeros((hid_units,), jnp.float32),
    }
    return params


def prepare_params(params, hid_units):
    """Fold / transpose / pre-cast parameters into the layouts the fused kernel
       consumes (MXU operands pre-cast to bf16; accumulation stays f32)."""
    H = hid_units
    R = len(params["gcn"])
    bf16 = jnp.bfloat16
    gcn_wT = jnp.concatenate([params["gcn"][r]["w"].T for r in range(R)],
                             axis=0).astype(bf16)                               # (R*H, FT)
    gcn_b = jnp.concatenate([params["gcn"][r]["b"] for r in range(R)]
                            ).reshape(R * H, 1)                                 # (R*H, 1) f32
    # attention Linear(no bias)->Linear(1) folded: score_r = h @ (W_r @ y_w_r) + y_b_r,
    # laid out block-diagonally so all R scores come from ONE matmul.
    wsc = jnp.zeros((R, R * H), jnp.float32)
    for r in range(R):
        weff_r = (params["w"][r] @ params["y"][r]["w"]).reshape(H)
        wsc = wsc.at[r, r * H:(r + 1) * H].set(weff_r)
    wsc = wsc.astype(bf16)                                                      # (R, R*H)
    att_yb = jnp.concatenate([params["y"][r]["b"] for r in range(R)]).reshape(R, 1)
    d = params["disc"]
    disc = {
        "We": d["W_e"],                                    # (H,H) f32 (tiny matvec, keep f32)
        "WiT": d["W_i"].T.astype(bf16),                    # (H,FT)
        "lfwT": d["lin_f_w"].T.astype(bf16),               # (H,FT)
        "lfb": d["lin_f_b"].reshape(H, 1),
        "WcfbT": d["lin_cf_w"][H:2 * H, :].T.astype(bf16), # (H,H)
        "lcf_topT": d["lin_cf_w"][:H, :].T,                # (H,H) f32
        "lcfb": d["lin_cf_b"].reshape(H, 1),
        "lcwT": d["lin_c_w"].T,                            # (H,H) f32
        "lcb": d["lin_c_b"].reshape(H, 1),
        "WjT": d["W_j"].T.astype(bf16),                    # (H,H)
        "bil_b": jnp.stack([d["b_e"], d["b_i"], d["b_j"]]).reshape(3, 1),
    }
    return {"gcn_wT": gcn_wT, "gcn_b": gcn_b, "wsc": wsc, "att_yb": att_yb, "disc": disc}


# ----------------------------- model forward ---------------------------------

def modeler_forward(prep, seq1, seq2, adj_stack):
    """Returns stacked logits (R+1, 3, 2N): rows = extrinsic / intrinsic / joint,
       pass index R is the fusion pass.  Slice into lists in the consumer."""
    R, N, _ = adj_stack.shape
    G = R + 1
    d = prep["disc"]
    # lane-dense node layout: both views side-by-side on the 2N(=128)-lane axis
    seq12T = jnp.concatenate([seq1, seq2], axis=0).T.astype(jnp.bfloat16)       # (FT, 2N)
    # block-diagonal transposed adjacency per relation: K = 2N lane-dense matmul
    adjT = jnp.swapaxes(adj_stack, -1, -2)                                      # (R, N, N)
    z = jnp.zeros_like(adjT)
    adjbdT = jnp.concatenate(
        [jnp.concatenate([adjT, z], axis=-1),
         jnp.concatenate([z, adjT], axis=-1)], axis=-2).astype(jnp.bfloat16)    # (R, 2N, 2N)

    kernel = functools.partial(_modeler_kernel, alpha=PRELU_ALPHA)
    return pl.pallas_call(
        kernel,
        out_shape=jax.ShapeDtypeStruct((G, 3, 2 * N), jnp.float32),
    )(seq12T, adjbdT, prep["gcn_wT"], prep["gcn_b"],
      prep["wsc"], prep["att_yb"],
      d["We"], d["WiT"], d["lfwT"], d["lfb"], d["WcfbT"],
      d["lcwT"], d["lcb"], d["lcf_topT"], d["lcfb"], d["WjT"], d["bil_b"])


# ----------------------------- driver -----------------------------------------

if __name__ == "__main__":
    N_NODES, FT, HID, R = 64, 32, 32, 2

    key = jax.random.PRNGKey(0)
    k_params, k_s1, k_s2, k_adj = jax.random.split(key, 4)

    params = init_params(k_params, FT, HID, R)
    prep = prepare_params(params, HID)

    seq1 = jax.random.normal(k_s1, (N_NODES, FT), jnp.float32)
    # corrupted view: row-shuffled features (DGI/HDMI negative sampling)
    seq2 = seq1[jax.random.permutation(k_s2, N_NODES)]

    adj_keys = jax.random.split(k_adj, R)
    adjs = []
    for r in range(R):
        a = jax.random.uniform(adj_keys[r], (N_NODES, N_NODES), jnp.float32)
        a = (a > 0.8).astype(jnp.float32) + jnp.eye(N_NODES, dtype=jnp.float32)
        a = a / jnp.sum(a, axis=-1, keepdims=True)     # row-normalised dense adjacency
        adjs.append(a)
    adj_stack = jnp.stack(adjs, axis=0)                # (R, N, N)

    fwd = jax.jit(modeler_forward)
    logits = jax.block_until_ready(fwd(prep, seq1, seq2, adj_stack))   # (R+1, 3, 2N)

    # slice into the original module's return structure in the consumer
    le_list = [logits[r, 0, :] for r in range(R)]
    li_list = [logits[r, 1, :] for r in range(R)]
    lj_list = [logits[r, 2, :] for r in range(R)]
    le_f, li_f, lj_f = logits[R, 0, :], logits[R, 1, :], logits[R, 2, :]

    assert logits.shape == (R + 1, 3, 2 * N_NODES)
    assert le_f.shape == (2 * N_NODES,) and li_f.shape == (2 * N_NODES,) and lj_f.shape == (2 * N_NODES,)
    assert all(l.shape == (2 * N_NODES,) for l in (le_list + li_list + lj_list))
    assert not bool(jnp.isnan(logits).any())
    print("KERNEL_OK")
</pallas_src>

<mosaic_0001>
module attributes {stable_mosaic.version = 11 : i64} {
  func.func @_modeler_kernel(%arg0: memref<32x128xbf16, #tpu.memory_space<vmem>>, %arg1: memref<2x128x128xbf16, #tpu.memory_space<vmem>>, %arg2: memref<64x32xbf16, #tpu.memory_space<vmem>>, %arg3: memref<64x1xf32, #tpu.memory_space<vmem>>, %arg4: memref<2x64xbf16, #tpu.memory_space<vmem>>, %arg5: memref<2x1xf32, #tpu.memory_space<vmem>>, %arg6: memref<32x32xf32, #tpu.memory_space<vmem>>, %arg7: memref<32x32xbf16, #tpu.memory_space<vmem>>, %arg8: memref<32x32xbf16, #tpu.memory_space<vmem>>, %arg9: memref<32x1xf32, #tpu.memory_space<vmem>>, %arg10: memref<32x32xbf16, #tpu.memory_space<vmem>>, %arg11: memref<32x32xf32, #tpu.memory_space<vmem>>, %arg12: memref<32x1xf32, #tpu.memory_space<vmem>>, %arg13: memref<32x32xf32, #tpu.memory_space<vmem>>, %arg14: memref<32x1xf32, #tpu.memory_space<vmem>>, %arg15: memref<32x32xbf16, #tpu.memory_space<vmem>>, %arg16: memref<3x1xf32, #tpu.memory_space<vmem>>, %arg17: memref<3x3x128xf32, #tpu.memory_space<vmem>>) attributes {dimension_semantics = [], scalar_prefetch = 0 : i64, scratch_operands = 0 : i64, tpu.core_type = #tpu.core_type<tc>} {
    %c0 = arith.constant 0 : index
    %c0_0 = arith.constant 0 : index
    %0 = vector.load %arg0[%c0, %c0_0] : memref<32x128xbf16, #tpu.memory_space<vmem>>, vector<32x128xbf16>
    %c0_1 = arith.constant 0 : index
    %c0_2 = arith.constant 0 : index
    %1 = vector.load %arg2[%c0_1, %c0_2] : memref<64x32xbf16, #tpu.memory_space<vmem>>, vector<64x32xbf16>
    %cst = arith.constant dense<0.000000e+00> : vector<64x128xf32>
    %2 = tpu.matmul %1, %0, %cst {dimension_numbers = #tpu.dot_dimension_numbers<[1], [0], [0], [1], [0, 0, 1, 1], [], []>} : vector<64x32xbf16>, vector<32x128xbf16>, vector<64x128xf32> -> vector<64x128xf32>
    %3 = vector.extract_strided_slice %2 {offsets = [0, 0], sizes = [32, 128], strides = [1, 1]} : vector<64x128xf32> to vector<32x128xf32>
    %4 = arith.truncf %3 : vector<32x128xf32> to vector<32x128xbf16>
    %c0_3 = arith.constant 0 : index
    %c0_4 = arith.constant 0 : index
    %c0_5 = arith.constant 0 : index
    %5 = vector.load %arg1[%c0_3, %c0_4, %c0_5] : memref<2x128x128xbf16, #tpu.memory_space<vmem>>, vector<1x128x128xbf16>
    %6 = vector.shape_cast %5 : vector<1x128x128xbf16> to vector<128x128xbf16>
    %cst_6 = arith.constant dense<0.000000e+00> : vector<32x128xf32>
    %7 = tpu.matmul %4, %6, %cst_6 {dimension_numbers = #tpu.dot_dimension_numbers<[1], [0], [0], [1], [0, 0, 1, 1], [], []>} : vector<32x128xbf16>, vector<128x128xbf16>, vector<32x128xf32> -> vector<32x128xf32>
    %c0_7 = arith.constant 0 : index
    %c0_8 = arith.constant 0 : index
    %8 = vector.load %arg3[%c0_7, %c0_8] : memref<64x1xf32, #tpu.memory_space<vmem>>, vector<32x1xf32>
    %9 = vector.broadcast %8 : vector<32x1xf32> to vector<32x128xf32>
    %10 = arith.addf %7, %9 : vector<32x128xf32>
    %cst_9 = arith.constant 0.000000e+00 : f32
    %11 = vector.broadcast %cst_9 : f32 to vector<32x128xf32>
    %12 = arith.cmpf oge, %10, %11 : vector<32x128xf32>
    %cst_10 = arith.constant 2.500000e-01 : f32
    %13 = vector.broadcast %cst_10 : f32 to vector<32x128xf32>
    %14 = arith.mulf %13, %10 : vector<32x128xf32>
    %15 = arith.select %12, %10, %14 : vector<32x128xi1>, vector<32x128xf32>
    %16 = vector.extract_strided_slice %2 {offsets = [32, 0], sizes = [32, 128], strides = [1, 1]} : vector<64x128xf32> to vector<32x128xf32>
    %17 = arith.truncf %16 : vector<32x128xf32> to vector<32x128xbf16>
    %c1 = arith.constant 1 : index
    %c0_11 = arith.constant 0 : index
    %c0_12 = arith.constant 0 : index
    %18 = vector.load %arg1[%c1, %c0_11, %c0_12] : memref<2x128x128xbf16, #tpu.memory_space<vmem>>, vector<1x128x128xbf16>
    %19 = vector.shape_cast %18 : vector<1x128x128xbf16> to vector<128x128xbf16>
    %cst_13 = arith.constant dense<0.000000e+00> : vector<32x128xf32>
    %20 = tpu.matmul %17, %19, %cst_13 {dimension_numbers = #tpu.dot_dimension_numbers<[1], [0], [0], [1], [0, 0, 1, 1], [], []>} : vector<32x128xbf16>, vector<128x128xbf16>, vector<32x128xf32> -> vector<32x128xf32>
    %c32 = arith.constant 32 : index
    %c0_14 = arith.constant 0 : index
    %21 = vector.load %arg3[%c32, %c0_14] : memref<64x1xf32, #tpu.memory_space<vmem>>, vector<32x1xf32>
    %22 = vector.broadcast %21 : vector<32x1xf32> to vector<32x128xf32>
    %23 = arith.addf %20, %22 : vector<32x128xf32>
    %cst_15 = arith.constant 0.000000e+00 : f32
    %24 = vector.broadcast %cst_15 : f32 to vector<32x128xf32>
    %25 = arith.cmpf oge, %23, %24 : vector<32x128xf32>
    %cst_16 = arith.constant 2.500000e-01 : f32
    %26 = vector.broadcast %cst_16 : f32 to vector<32x128xf32>
    %27 = arith.mulf %26, %23 : vector<32x128xf32>
    %28 = arith.select %25, %23, %27 : vector<32x128xi1>, vector<32x128xf32>
    %29 = tpu.concatenate %15, %28 in 0 : vector<32x128xf32>, vector<32x128xf32> -> vector<64x128xf32>
    %c0_17 = arith.constant 0 : index
    %c0_18 = arith.constant 0 : index
    %30 = vector.load %arg4[%c0_17, %c0_18] : memref<2x64xbf16, #tpu.memory_space<vmem>>, vector<2x64xbf16>
    %31 = arith.truncf %29 : vector<64x128xf32> to vector<64x128xbf16>
    %cst_19 = arith.constant dense<0.000000e+00> : vector<2x128xf32>
    %32 = tpu.matmul %30, %31, %cst_19 {dimension_numbers = #tpu.dot_dimension_numbers<[1], [0], [0], [1], [0, 0, 1, 1], [], []>} : vector<2x64xbf16>, vector<64x128xbf16>, vector<2x128xf32> -> vector<2x128xf32>
    %c0_20 = arith.constant 0 : index
    %c0_21 = arith.constant 0 : index
    %33 = vector.load %arg5[%c0_20, %c0_21] : memref<2x1xf32, #tpu.memory_space<vmem>>, vector<2x1xf32>
    %34 = vector.broadcast %33 : vector<2x1xf32> to vector<2x128xf32>
    %35 = arith.addf %32, %34 : vector<2x128xf32>
    %36 = math.tanh %35 : vector<2x128xf32>
    %cst_22 = arith.constant dense<0xFF800000> : vector<128xf32>
    %37 = vector.multi_reduction <maximumf>, %36, %cst_22 [0] : vector<2x128xf32> to vector<128xf32>
    %38 = vector.shape_cast %37 : vector<128xf32> to vector<1x128xf32>
    %39 = vector.broadcast %38 : vector<1x128xf32> to vector<2x128xf32>
    %40 = arith.subf %36, %39 : vector<2x128xf32>
    %41 = math.exp %40 : vector<2x128xf32>
    %cst_23 = arith.constant dense<0.000000e+00> : vector<128xf32>
    %42 = vector.multi_reduction <add>, %41, %cst_23 [0] : vector<2x128xf32> to vector<128xf32>
    %43 = vector.shape_cast %42 : vector<128xf32> to vector<1x128xf32>
    %44 = vector.broadcast %43 : vector<1x128xf32> to vector<2x128xf32>
    %45 = arith.divf %41, %44 : vector<2x128xf32>
    %46 = vector.extract_strided_slice %45 {offsets = [0, 0], sizes = [1, 128], strides = [1, 1]} : vector<2x128xf32> to vector<1x128xf32>
    %47 = vector.broadcast %46 : vector<1x128xf32> to vector<32x128xf32>
    %48 = arith.mulf %47, %15 : vector<32x128xf32>
    %49 = vector.extract_strided_slice %45 {offsets = [1, 0], sizes = [1, 128], strides = [1, 1]} : vector<2x128xf32> to vector<1x128xf32>
    %50 = vector.broadcast %49 : vector<1x128xf32> to vector<32x128xf32>
    %51 = arith.mulf %50, %28 : vector<32x128xf32>
    %52 = arith.addf %48, %51 : vector<32x128xf32>
    %c0_24 = arith.constant 0 : index
    %c0_25 = arith.constant 0 : index
    %53 = vector.load %arg7[%c0_24, %c0_25] : memref<32x32xbf16, #tpu.memory_space<vmem>>, vector<32x32xbf16>
    %cst_26 = arith.constant dense<0.000000e+00> : vector<32x128xf32>
    %54 = tpu.matmul %53, %0, %cst_26 {dimension_numbers = #tpu.dot_dimension_numbers<[1], [0], [0], [1], [0, 0, 1, 1], [], []>} : vector<32x32xbf16>, vector<32x128xbf16>, vector<32x128xf32> -> vector<32x128xf32>
    %c0_27 = arith.constant 0 : index
    %c0_28 = arith.constant 0 : index
    %55 = vector.load %arg8[%c0_27, %c0_28] : memref<32x32xbf16, #tpu.memory_space<vmem>>, vector<32x32xbf16>
    %cst_29 = arith.constant dense<0.000000e+00> : vector<32x128xf32>
    %56 = tpu.matmul %55, %0, %cst_29 {dimension_numbers = #tpu.dot_dimension_numbers<[1], [0], [0], [1], [0, 0, 1, 1], [], []>} : vector<32x32xbf16>, vector<32x128xbf16>, vector<32x128xf32> -> vector<32x128xf32>
    %c0_30 = arith.constant 0 : index
    %c0_31 = arith.constant 0 : index
    %57 = vector.load %arg9[%c0_30, %c0_31] : memref<32x1xf32, #tpu.memory_space<vmem>>, vector<32x1xf32>
    %58 = vector.broadcast %57 : vector<32x1xf32> to vector<32x128xf32>
    %59 = arith.addf %56, %58 : vector<32x128xf32>
    %60 = math.tanh %59 : vector<32x128xf32>
    %c0_32 = arith.constant 0 : index
    %c0_33 = arith.constant 0 : index
    %61 = vector.load %arg10[%c0_32, %c0_33] : memref<32x32xbf16, #tpu.memory_space<vmem>>, vector<32x32xbf16>
    %62 = arith.truncf %60 : vector<32x128xf32> to vector<32x128xbf16>
    %cst_34 = arith.constant dense<0.000000e+00> : vector<32x128xf32>
    %63 = tpu.matmul %61, %62, %cst_34 {dimension_numbers = #tpu.dot_dimension_numbers<[1], [0], [0], [1], [0, 0, 1, 1], [], []>} : vector<32x32xbf16>, vector<32x128xbf16>, vector<32x128xf32> -> vector<32x128xf32>
    %c0_35 = arith.constant 0 : index
    %c0_36 = arith.constant 0 : index
    %64 = vector.load %arg16[%c0_35, %c0_36] : memref<3x1xf32, #tpu.memory_space<vmem>>, vector<1x1xf32>
    %c1_37 = arith.constant 1 : index
    %c0_38 = arith.constant 0 : index
    %65 = vector.load %arg16[%c1_37, %c0_38] : memref<3x1xf32, #tpu.memory_space<vmem>>, vector<1x1xf32>
    %c2 = arith.constant 2 : index
    %c0_39 = arith.constant 0 : index
    %66 = vector.load %arg16[%c2, %c0_39] : memref<3x1xf32, #tpu.memory_space<vmem>>, vector<1x1xf32>
    %67 = tpu.iota {dimensions = array<i32: 1>} : vector<32x128xi32>
    %c64_i32 = arith.constant 64 : i32
    %68 = vector.broadcast %c64_i32 : i32 to vector<32x128xi32>
    %69 = arith.cmpi slt, %67, %68 : vector<32x128xi32>
    %c64_i32_40 = arith.constant 64 : i32
    %70 = tpu.dynamic_rotate %15 by %c64_i32_40 dim 1 : vector<32x128xf32>, i32 -> vector<32x128xf32>
    %71 = arith.select %69, %15, %70 : vector<32x128xi1>, vector<32x128xf32>
    %cst_41 = arith.constant dense<0.000000e+00> : vector<32xf32>
    %72 = vector.multi_reduction <add>, %71, %cst_41 [1] : vector<32x128xf32> to vector<32xf32>
    %73 = vector.shape_cast %72 : vector<32xf32> to vector<32x1xf32>
    %cst_42 = arith.constant 7.812500e-03 : f32
    %74 = vector.broadcast %cst_42 : f32 to vector<32x1xf32>
    %75 = arith.mulf %73, %74 : vector<32x1xf32>
    %c0_43 = arith.constant 0 : index
    %c0_44 = arith.constant 0 : index
    %76 = vector.load %arg6[%c0_43, %c0_44] : memref<32x32xf32, #tpu.memory_space<vmem>>, vector<32x32xf32>
    %cst_45 = arith.constant dense<0.000000e+00> : vector<32x1xf32>
    %77 = tpu.matmul %76, %75, %cst_45 {dimension_numbers = #tpu.dot_dimension_numbers<[1], [0], [0], [1], [0, 0, 1, 1], [], []>} : vector<32x32xf32>, vector<32x1xf32>, vector<32x1xf32> -> vector<32x1xf32>
    %78 = vector.broadcast %77 : vector<32x1xf32> to vector<32x128xf32>
    %79 = arith.mulf %15, %78 : vector<32x128xf32>
    %cst_46 = arith.constant dense<0.000000e+00> : vector<128xf32>
    %80 = vector.multi_reduction <add>, %79, %cst_46 [0] : vector<32x128xf32> to vector<128xf32>
    %81 = vector.shape_cast %80 : vector<128xf32> to vector<1x128xf32>
    %82 = vector.broadcast %64 : vector<1x1xf32> to vector<1x128xf32>
    %83 = arith.addf %81, %82 : vector<1x128xf32>
    %84 = arith.mulf %54, %71 : vector<32x128xf32>
    %cst_47 = arith.constant dense<0.000000e+00> : vector<128xf32>
    %85 = vector.multi_reduction <add>, %84, %cst_47 [0] : vector<32x128xf32> to vector<128xf32>
    %86 = vector.shape_cast %85 : vector<128xf32> to vector<1x128xf32>
    %87 = vector.broadcast %65 : vector<1x1xf32> to vector<1x128xf32>
    %88 = arith.addf %86, %87 : vector<1x128xf32>
    %c0_48 = arith.constant 0 : index
    %c0_49 = arith.constant 0 : index
    %89 = vector.load %arg11[%c0_48, %c0_49] : memref<32x32xf32, #tpu.memory_space<vmem>>, vector<32x32xf32>
    %cst_50 = arith.constant dense<0.000000e+00> : vector<32x1xf32>
    %90 = tpu.matmul %89, %75, %cst_50 {dimension_numbers = #tpu.dot_dimension_numbers<[1], [0], [0], [1], [0, 0, 1, 1], [], []>} : vector<32x32xf32>, vector<32x1xf32>, vector<32x1xf32> -> vector<32x1xf32>
    %c0_51 = arith.constant 0 : index
    %c0_52 = arith.constant 0 : index
    %91 = vector.load %arg12[%c0_51, %c0_52] : memref<32x1xf32, #tpu.memory_space<vmem>>, vector<32x1xf32>
    %92 = arith.addf %90, %91 : vector<32x1xf32>
    %93 = math.tanh %92 : vector<32x1xf32>
    %c0_53 = arith.constant 0 : index
    %c0_54 = arith.constant 0 : index
    %94 = vector.load %arg13[%c0_53, %c0_54] : memref<32x32xf32, #tpu.memory_space<vmem>>, vector<32x32xf32>
    %cst_55 = arith.constant dense<0.000000e+00> : vector<32x1xf32>
    %95 = tpu.matmul %94, %93, %cst_55 {dimension_numbers = #tpu.dot_dimension_numbers<[1], [0], [0], [1], [0, 0, 1, 1], [], []>} : vector<32x32xf32>, vector<32x1xf32>, vector<32x1xf32> -> vector<32x1xf32>
    %96 = vector.broadcast %95 : vector<32x1xf32> to vector<32x128xf32>
    %97 = arith.addf %96, %63 : vector<32x128xf32>
    %c0_56 = arith.constant 0 : index
    %c0_57 = arith.constant 0 : index
    %98 = vector.load %arg14[%c0_56, %c0_57] : memref<32x1xf32, #tpu.memory_space<vmem>>, vector<32x1xf32>
    %99 = vector.broadcast %98 : vector<32x1xf32> to vector<32x128xf32>
    %100 = arith.addf %97, %99 : vector<32x128xf32>
    %101 = math.tanh %100 : vector<32x128xf32>
    %c0_58 = arith.constant 0 : index
    %c0_59 = arith.constant 0 : index
    %102 = vector.load %arg15[%c0_58, %c0_59] : memref<32x32xbf16, #tpu.memory_space<vmem>>, vector<32x32xbf16>
    %103 = arith.truncf %101 : vector<32x128xf32> to vector<32x128xbf16>
    %cst_60 = arith.constant dense<0.000000e+00> : vector<32x128xf32>
    %104 = tpu.matmul %102, %103, %cst_60 {dimension_numbers = #tpu.dot_dimension_numbers<[1], [0], [0], [1], [0, 0, 1, 1], [], []>} : vector<32x32xbf16>, vector<32x128xbf16>, vector<32x128xf32> -> vector<32x128xf32>
    %105 = arith.mulf %104, %71 : vector<32x128xf32>
    %cst_61 = arith.constant dense<0.000000e+00> : vector<128xf32>
    %106 = vector.multi_reduction <add>, %105, %cst_61 [0] : vector<32x128xf32> to vector<128xf32>
    %107 = vector.shape_cast %106 : vector<128xf32> to vector<1x128xf32>
    %108 = vector.broadcast %66 : vector<1x1xf32> to vector<1x128xf32>
    %109 = arith.addf %107, %108 : vector<1x128xf32>
    %110 = tpu.concatenate %83, %88, %109 in 0 : vector<1x128xf32>, vector<1x128xf32>, vector<1x128xf32> -> vector<3x128xf32>
    %c64_i32_62 = arith.constant 64 : i32
    %111 = tpu.dynamic_rotate %28 by %c64_i32_62 dim 1 : vector<32x128xf32>, i32 -> vector<32x128xf32>
    %112 = arith.select %69, %28, %111 : vector<32x128xi1>, vector<32x128xf32>
    %cst_63 = arith.constant dense<0.000000e+00> : vector<32xf32>
    %113 = vector.multi_reduction <add>, %112, %cst_63 [1] : vector<32x128xf32> to vector<32xf32>
    %114 = vector.shape_cast %113 : vector<32xf32> to vector<32x1xf32>
    %cst_64 = arith.constant 7.812500e-03 : f32
    %115 = vector.broadcast %cst_64 : f32 to vector<32x1xf32>
    %116 = arith.mulf %114, %115 : vector<32x1xf32>
    %c0_65 = arith.constant 0 : index
    %c0_66 = arith.constant 0 : index
    %117 = vector.load %arg6[%c0_65, %c0_66] : memref<32x32xf32, #tpu.memory_space<vmem>>, vector<32x32xf32>
    %cst_67 = arith.constant dense<0.000000e+00> : vector<32x1xf32>
    %118 = tpu.matmul %117, %116, %cst_67 {dimension_numbers = #tpu.dot_dimension_numbers<[1], [0], [0], [1], [0, 0, 1, 1], [], []>} : vector<32x32xf32>, vector<32x1xf32>, vector<32x1xf32> -> vector<32x1xf32>
    %119 = vector.broadcast %118 : vector<32x1xf32> to vector<32x128xf32>
    %120 = arith.mulf %28, %119 : vector<32x128xf32>
    %cst_68 = arith.constant dense<0.000000e+00> : vector<128xf32>
    %121 = vector.multi_reduction <add>, %120, %cst_68 [0] : vector<32x128xf32> to vector<128xf32>
    %122 = vector.shape_cast %121 : vector<128xf32> to vector<1x128xf32>
    %123 = vector.broadcast %64 : vector<1x1xf32> to vector<1x128xf32>
    %124 = arith.addf %122, %123 : vector<1x128xf32>
    %125 = arith.mulf %54, %112 : vector<32x128xf32>
    %cst_69 = arith.constant dense<0.000000e+00> : vector<128xf32>
    %126 = vector.multi_reduction <add>, %125, %cst_69 [0] : vector<32x128xf32> to vector<128xf32>
    %127 = vector.shape_cast %126 : vector<128xf32> to vector<1x128xf32>
    %128 = vector.broadcast %65 : vector<1x1xf32> to vector<1x128xf32>
    %129 = arith.addf %127, %128 : vector<1x128xf32>
    %c0_70 = arith.constant 0 : index
    %c0_71 = arith.constant 0 : index
    %130 = vector.load %arg11[%c0_70, %c0_71] : memref<32x32xf32, #tpu.memory_space<vmem>>, vector<32x32xf32>
    %cst_72 = arith.constant dense<0.000000e+00> : vector<32x1xf32>
    %131 = tpu.matmul %130, %116, %cst_72 {dimension_numbers = #tpu.dot_dimension_numbers<[1], [0], [0], [1], [0, 0, 1, 1], [], []>} : vector<32x32xf32>, vector<32x1xf32>, vector<32x1xf32> -> vector<32x1xf32>
    %c0_73 = arith.constant 0 : index
    %c0_74 = arith.constant 0 : index
    %132 = vector.load %arg12[%c0_73, %c0_74] : memref<32x1xf32, #tpu.memory_space<vmem>>, vector<32x1xf32>
    %133 = arith.addf %131, %132 : vector<32x1xf32>
    %134 = math.tanh %133 : vector<32x1xf32>
    %c0_75 = arith.constant 0 : index
    %c0_76 = arith.constant 0 : index
    %135 = vector.load %arg13[%c0_75, %c0_76] : memref<32x32xf32, #tpu.memory_space<vmem>>, vector<32x32xf32>
    %cst_77 = arith.constant dense<0.000000e+00> : vector<32x1xf32>
    %136 = tpu.matmul %135, %134, %cst_77 {dimension_numbers = #tpu.dot_dimension_numbers<[1], [0], [0], [1], [0, 0, 1, 1], [], []>} : vector<32x32xf32>, vector<32x1xf32>, vector<32x1xf32> -> vector<32x1xf32>
    %137 = vector.broadcast %136 : vector<32x1xf32> to vector<32x128xf32>
    %138 = arith.addf %137, %63 : vector<32x128xf32>
    %c0_78 = arith.constant 0 : index
    %c0_79 = arith.constant 0 : index
    %139 = vector.load %arg14[%c0_78, %c0_79] : memref<32x1xf32, #tpu.memory_space<vmem>>, vector<32x1xf32>
    %140 = vector.broadcast %139 : vector<32x1xf32> to vector<32x128xf32>
    %141 = arith.addf %138, %140 : vector<32x128xf32>
    %142 = math.tanh %141 : vector<32x128xf32>
    %c0_80 = arith.constant 0 : index
    %c0_81 = arith.constant 0 : index
    %143 = vector.load %arg15[%c0_80, %c0_81] : memref<32x32xbf16, #tpu.memory_space<vmem>>, vector<32x32xbf16>
    %144 = arith.truncf %142 : vector<32x128xf32> to vector<32x128xbf16>
    %cst_82 = arith.constant dense<0.000000e+00> : vector<32x128xf32>
    %145 = tpu.matmul %143, %144, %cst_82 {dimension_numbers = #tpu.dot_dimension_numbers<[1], [0], [0], [1], [0, 0, 1, 1], [], []>} : vector<32x32xbf16>, vector<32x128xbf16>, vector<32x128xf32> -> vector<32x128xf32>
    %146 = arith.mulf %145, %112 : vector<32x128xf32>
    %cst_83 = arith.constant dense<0.000000e+00> : vector<128xf32>
    %147 = vector.multi_reduction <add>, %146, %cst_83 [0] : vector<32x128xf32> to vector<128xf32>
    %148 = vector.shape_cast %147 : vector<128xf32> to vector<1x128xf32>
    %149 = vector.broadcast %66 : vector<1x1xf32> to vector<1x128xf32>
    %150 = arith.addf %148, %149 : vector<1x128xf32>
    %151 = tpu.concatenate %124, %129, %150 in 0 : vector<1x128xf32>, vector<1x128xf32>, vector<1x128xf32> -> vector<3x128xf32>
    %c64_i32_84 = arith.constant 64 : i32
    %152 = tpu.dynamic_rotate %52 by %c64_i32_84 dim 1 : vector<32x128xf32>, i32 -> vector<32x128xf32>
    %153 = arith.select %69, %52, %152 : vector<32x128xi1>, vector<32x128xf32>
    %cst_85 = arith.constant dense<0.000000e+00> : vector<32xf32>
    %154 = vector.multi_reduction <add>, %153, %cst_85 [1] : vector<32x128xf32> to vector<32xf32>
    %155 = vector.shape_cast %154 : vector<32xf32> to vector<32x1xf32>
    %cst_86 = arith.constant 7.812500e-03 : f32
    %156 = vector.broadcast %cst_86 : f32 to vector<32x1xf32>
    %157 = arith.mulf %155, %156 : vector<32x1xf32>
    %c0_87 = arith.constant 0 : index
    %c0_88 = arith.constant 0 : index
    %158 = vector.load %arg6[%c0_87, %c0_88] : memref<32x32xf32, #tpu.memory_space<vmem>>, vector<32x32xf32>
    %cst_89 = arith.constant dense<0.000000e+00> : vector<32x1xf32>
    %159 = tpu.matmul %158, %157, %cst_89 {dimension_numbers = #tpu.dot_dimension_numbers<[1], [0], [0], [1], [0, 0, 1, 1], [], []>} : vector<32x32xf32>, vector<32x1xf32>, vector<32x1xf32> -> vector<32x1xf32>
    %160 = vector.broadcast %159 : vector<32x1xf32> to vector<32x128xf32>
    %161 = arith.mulf %52, %160 : vector<32x128xf32>
    %cst_90 = arith.constant dense<0.000000e+00> : vector<128xf32>
    %162 = vector.multi_reduction <add>, %161, %cst_90 [0] : vector<32x128xf32> to vector<128xf32>
    %163 = vector.shape_cast %162 : vector<128xf32> to vector<1x128xf32>
    %164 = vector.broadcast %64 : vector<1x1xf32> to vector<1x128xf32>
    %165 = arith.addf %163, %164 : vector<1x128xf32>
    %166 = arith.mulf %54, %153 : vector<32x128xf32>
    %cst_91 = arith.constant dense<0.000000e+00> : vector<128xf32>
    %167 = vector.multi_reduction <add>, %166, %cst_91 [0] : vector<32x128xf32> to vector<128xf32>
    %168 = vector.shape_cast %167 : vector<128xf32> to vector<1x128xf32>
    %169 = vector.broadcast %65 : vector<1x1xf32> to vector<1x128xf32>
    %170 = arith.addf %168, %169 : vector<1x128xf32>
    %c0_92 = arith.constant 0 : index
    %c0_93 = arith.constant 0 : index
    %171 = vector.load %arg11[%c0_92, %c0_93] : memref<32x32xf32, #tpu.memory_space<vmem>>, vector<32x32xf32>
    %cst_94 = arith.constant dense<0.000000e+00> : vector<32x1xf32>
    %172 = tpu.matmul %171, %157, %cst_94 {dimension_numbers = #tpu.dot_dimension_numbers<[1], [0], [0], [1], [0, 0, 1, 1], [], []>} : vector<32x32xf32>, vector<32x1xf32>, vector<32x1xf32> -> vector<32x1xf32>
    %c0_95 = arith.constant 0 : index
    %c0_96 = arith.constant 0 : index
    %173 = vector.load %arg12[%c0_95, %c0_96] : memref<32x1xf32, #tpu.memory_space<vmem>>, vector<32x1xf32>
    %174 = arith.addf %172, %173 : vector<32x1xf32>
    %175 = math.tanh %174 : vector<32x1xf32>
    %c0_97 = arith.constant 0 : index
    %c0_98 = arith.constant 0 : index
    %176 = vector.load %arg13[%c0_97, %c0_98] : memref<32x32xf32, #tpu.memory_space<vmem>>, vector<32x32xf32>
    %cst_99 = arith.constant dense<0.000000e+00> : vector<32x1xf32>
    %177 = tpu.matmul %176, %175, %cst_99 {dimension_numbers = #tpu.dot_dimension_numbers<[1], [0], [0], [1], [0, 0, 1, 1], [], []>} : vector<32x32xf32>, vector<32x1xf32>, vector<32x1xf32> -> vector<32x1xf32>
    %178 = vector.broadcast %177 : vector<32x1xf32> to vector<32x128xf32>
    %179 = arith.addf %178, %63 : vector<32x128xf32>
    %c0_100 = arith.constant 0 : index
    %c0_101 = arith.constant 0 : index
    %180 = vector.load %arg14[%c0_100, %c0_101] : memref<32x1xf32, #tpu.memory_space<vmem>>, vector<32x1xf32>
    %181 = vector.broadcast %180 : vector<32x1xf32> to vector<32x128xf32>
    %182 = arith.addf %179, %181 : vector<32x128xf32>
    %183 = math.tanh %182 : vector<32x128xf32>
    %c0_102 = arith.constant 0 : index
    %c0_103 = arith.constant 0 : index
    %184 = vector.load %arg15[%c0_102, %c0_103] : memref<32x32xbf16, #tpu.memory_space<vmem>>, vector<32x32xbf16>
    %185 = arith.truncf %183 : vector<32x128xf32> to vector<32x128xbf16>
    %cst_104 = arith.constant dense<0.000000e+00> : vector<32x128xf32>
    %186 = tpu.matmul %184, %185, %cst_104 {dimension_numbers = #tpu.dot_dimension_numbers<[1], [0], [0], [1], [0, 0, 1, 1], [], []>} : vector<32x32xbf16>, vector<32x128xbf16>, vector<32x128xf32> -> vector<32x128xf32>
    %187 = arith.mulf %186, %153 : vector<32x128xf32>
    %cst_105 = arith.constant dense<0.000000e+00> : vector<128xf32>
    %188 = vector.multi_reduction <add>, %187, %cst_105 [0] : vector<32x128xf32> to vector<128xf32>
    %189 = vector.shape_cast %188 : vector<128xf32> to vector<1x128xf32>
    %190 = vector.broadcast %66 : vector<1x1xf32> to vector<1x128xf32>
    %191 = arith.addf %189, %190 : vector<1x128xf32>
    %192 = tpu.concatenate %165, %170, %191 in 0 : vector<1x128xf32>, vector<1x128xf32>, vector<1x128xf32> -> vector<3x128xf32>
    %193 = vector.shape_cast %110 : vector<3x128xf32> to vector<1x3x128xf32>
    %194 = vector.shape_cast %151 : vector<3x128xf32> to vector<1x3x128xf32>
    %195 = vector.shape_cast %192 : vector<3x128xf32> to vector<1x3x128xf32>
    %196 = tpu.concatenate %193, %194, %195 in 0 : vector<1x3x128xf32>, vector<1x3x128xf32>, vector<1x3x128xf32> -> vector<3x3x128xf32>
    %c0_106 = arith.constant 0 : index
    %c0_107 = arith.constant 0 : index
    %c0_108 = arith.constant 0 : index
    %197 = vector.load %arg17[%c0_106, %c0_107, %c0_108] : memref<3x3x128xf32, #tpu.memory_space<vmem>>, vector<3x3x128xf32>
    tpu.vector_store %arg17[%c0_106, %c0_107, %c0_108], %196 {strides = array<i32>} : memref<3x3x128xf32, #tpu.memory_space<vmem>>, vector<3x3x128xf32>,
    return
  }
}

</mosaic_0001>

<bundles_post_ra>
// kernel: modeler_forward.1
= control target key start
LH: loop header
LB: loop body
LE: loop exit
PB: predicated region body
PF: predicated region fallthrough
CT: control target
= control target key end

     0   :  { %s2499_s0 = inlined_call_operand.vmem [shape: bf16[32,128], index: 0, kind: input, shape index: {}]   ;;  %s2500_s1 = inlined_call_operand.vmem [shape: bf16[2,128,128], index: 1, kind: input, shape index: {}]   ;;  %s2501_s2 = inlined_call_operand.vmem [shape: bf16[64,32], index: 2, kind: input, shape index: {}]   ;;  %s2502_s3 = inlined_call_operand.vmem [shape: f32[64,1], index: 3, kind: input, shape index: {}]   ;;  %s2503_s4 = inlined_call_operand.vmem [shape: bf16[2,64], index: 4, kind: input, shape index: {}]   ;;  %s2504_s5 = inlined_call_operand.vmem [shape: f32[2,1], index: 5, kind: input, shape index: {}]   ;;  %s2505_s6 = inlined_call_operand.vmem [shape: f32[32,32], index: 6, kind: input, shape index: {}]   ;;  %s2506_s7 = inlined_call_operand.vmem [shape: bf16[32,32], index: 7, kind: input, shape index: {}]   ;;  %s2507_s8 = inlined_call_operand.vmem [shape: bf16[32,32], index: 8, kind: input, shape index: {}]   ;;  %s2508_s9 = inlined_call_operand.vmem [shape: f32[32,1], index: 9, kind: input, shape index: {}]   ;;  %s2509_s10 = inlined_call_operand.vmem [shape: bf16[32,32], index: 10, kind: input, shape index: {}]   ;;  %s2510_s11 = inlined_call_operand.vmem [shape: f32[32,32], index: 11, kind: input, shape index: {}]   ;;  %s2511_s12 = inlined_call_operand.vmem [shape: f32[32,1], index: 12, kind: input, shape index: {}]   ;;  %s2512_s13 = inlined_call_operand.vmem [shape: f32[32,32], index: 13, kind: input, shape index: {}]   ;;  %s2513_s14 = inlined_call_operand.vmem [shape: f32[32,1], index: 14, kind: input, shape index: {}]   ;;  %s2514_s15 = inlined_call_operand.vmem [shape: bf16[32,32], index: 15, kind: input, shape index: {}]   ;;  %s2515_s16 = inlined_call_operand.vmem [shape: f32[3,1], index: 16, kind: input, shape index: {}]   ;;  %s2516_s17 = inlined_call_operand.hbm [shape: f32[3,3,128], index: 17, kind: output, shape index: {}]  }
   0x1   :  { %2521 = sst [smem:[#allocation7_spill]] %s2499_s0 }
   0x2   :  { %2522 = sst [smem:[#allocation8_spill]] %s2500_s1 }
   0x3   :  { %s2523_s26 = sld [smem:[#allocation7_spill]] }
   0x9   :  { %v1884_v0 = vld [vmem:[%s2523_s26 + $0x8] sm:$0xff] }
   0xa   :  { %22 = vsyncpa [#allocation3], 0  ;;  %121 = vmatpush.bf16.msra.mxu0 %v1884_v0  ;;  %v1890_v1 = vld [vmem:[%s2523_s26] sm:$0xff]  ;;  %vm102_vm0 = vcmask 261120   ;;  %v1655_v3 = vld [vmem:[%s2501_s2 + $0x8] sm:$0xff]  ;;  %s2524_s20 = sld [smem:[#allocation8_spill]] }
   0xb   :  { %v1654_v2 = vld [vmem:[%s2501_s2] sm:$0xff]  ;;  %v1656_v8 = vld [vmem:[%s2501_s2 + $0x10] sm:$0xff]  ;;  %v1657_v10 = vld [vmem:[%s2501_s2 + $0x18] sm:$0xff]  ;;  %v1787_v14 = vmov 0   ;;  %vm398_vm9 = vcmask 523264   ;;  %vm416_vm11 = vcmask 1041408  }
   0xc   :  { %v286_v13 = vld [vmem:[%s2502_s3 + $0x30] sm:$0xff]  ;;  %1696 = vset.pattern.permute.xlu0 %v1787_v14  ;;  %1697 = vset.pattern.permute.xlu1 %v1787_v14  ;;  %v284_v17 = vld [vmem:[%s2502_s3 + $0x20] sm:$0xff]  ;;  %v287_v18 = vld [vmem:[%s2502_s3 + $0x38] sm:$0xff]  ;;  %s1451_s29 = sshll.u32 %s2516_s17, 4  ;;  %s1452_s29 = int_to_ptr.hbm [resolvable:$true] %s1451_s29 }
   0xd   :  { %300 = vperm.xlu0 %1696, %v286_v13   ;;  %1698 = vset.pattern.permute.xlu2 %v1787_v14  ;;  %v285_v21 = vld [vmem:[%s2502_s3 + $0x28] sm:$0xff]  ;;  %v162_v22 = vld [vmem:[%s2502_s3] sm:$0xff]  ;;  %v164_v35 = vld [vmem:[%s2502_s3 + $0x10] sm:$0xff] }
   0xe   :  { %122 = vmatpush.bf16.msra.mxu0 %v1890_v1  ;;  %290 = vperm.xlu1 %1697, %v284_v17   ;;  %v163_v25 = vld [vmem:[%s2502_s3 + $0x8] sm:$0xff]  ;;  %v165_v37 = vld [vmem:[%s2502_s3 + $0x18] sm:$0xff]  ;;  %v392_v40 = vld [vmem:[%s2504_s5] sm:$0x3]  ;;  %s1788_s3 = smov 64  }
   0xf   :  { %178 = vperm.xlu2 %1698, %v164_v35  }
  0x10   :  { %v1665_v4 = vld [vmem:[%s2524_s20 + $0x38] sm:$0xff]  ;;  %v1664_v5 = vld [vmem:[%s2524_s20 + $0x30] sm:$0xff]  ;;  %v1663_v6 = vld [vmem:[%s2524_s20 + $0x28] sm:$0xff] }
  0x11   :  { %1487 = vmatmul.msk.bf16.vlgmr.msra.gmra.mxu0 %vm102_vm0, %v1654_v2  ;;  %234 = vmatpush.bf16.msra.mxu1 %v1665_v4  ;;  %v1662_v7 = vld [vmem:[%s2524_s20 + $0x20] sm:$0xff]  ;;  %v1661_v9 = vld [vmem:[%s2524_s20 + $0x18] sm:$0xff]  ;;  %v1660_v11 = vld [vmem:[%s2524_s20 + $0x10] sm:$0xff] }
  0x12   :  { %v1659_v12 = vld [vmem:[%s2524_s20 + $0x8] sm:$0xff]  ;;  %v1658_v15 = vld [vmem:[%s2524_s20] sm:$0xff]  ;;  %v1673_v16 = vld [vmem:[%s2524_s20 + $0x78] sm:$0xff] }
  0x13   :  { %356 = vmatpush.bf16.msrb.mxu0 %v1673_v16  ;;  %1682 = vmatpush.bf16.msra.mxu2 %v1673_v16  ;;  %v1672_v19 = vld [vmem:[%s2524_s20 + $0x70] sm:$0xff]  ;;  %v1671_v20 = vld [vmem:[%s2524_s20 + $0x68] sm:$0xff]  ;;  %v1670_v23 = vld [vmem:[%s2524_s20 + $0x60] sm:$0xff] }
  0x14   :  { %v1669_v24 = vld [vmem:[%s2524_s20 + $0x58] sm:$0xff]  ;;  %v1668_v26 = vld [vmem:[%s2524_s20 + $0x50] sm:$0xff]  ;;  %v1667_v28 = vld [vmem:[%s2524_s20 + $0x48] sm:$0xff] }
  0x15   :  { %235 = vmatpush.bf16.msra.mxu1 %v1664_v5  ;;  %305 = vperm.xlu0 %1696, %v287_v18   ;;  %v1666_v29 = vld [vmem:[%s2524_s20 + $0x40] sm:$0xff] }
  0x16   :  { %295 = vperm.xlu1 %1697, %v285_v21  }
  0x17   :  { %357 = vmatpush.bf16.msrb.mxu0 %v1672_v19  ;;  %1683 = vmatpush.bf16.msra.mxu2 %v1672_v19 }
  0x18   :  { %183 = vperm.xlu2 %1698, %v165_v37  }
  0x19   :  { %236 = vmatpush.bf16.msra.mxu1 %v1663_v6 }
  0x1b   :  { %358 = vmatpush.bf16.msrb.mxu0 %v1671_v20  ;;  %1684 = vmatpush.bf16.msra.mxu2 %v1671_v20 }
  0x1d   :  { %237 = vmatpush.bf16.msra.mxu1 %v1662_v7  ;;  %168 = vperm.xlu0 %1696, %v162_v22  }
  0x1e   :  { %173 = vperm.xlu1 %1697, %v163_v25  }
  0x1f   :  { %359 = vmatpush.bf16.msrb.mxu0 %v1670_v23  ;;  %1685 = vmatpush.bf16.msra.mxu2 %v1670_v23 }
  0x20   :  { %395 = vperm.xlu2 %1698, %v392_v40  }
  0x21   :  { %1488 = vmatmul.msk.bf16.gmra.mxu0 %vm102_vm0, %v1655_v3  ;;  %238 = vmatpush.bf16.msra.mxu1 %v1661_v9 }
  0x23   :  { %360 = vmatpush.bf16.msrb.mxu0 %v1669_v24  ;;  %1686 = vmatpush.bf16.msra.mxu2 %v1669_v24 }
  0x25   :  { %239 = vmatpush.bf16.msra.mxu1 %v1660_v11 }
  0x27   :  { %361 = vmatpush.bf16.msrb.mxu0 %v1668_v26  ;;  %1687 = vmatpush.bf16.msra.mxu2 %v1668_v26  ;;  %v387_v26 = vld [vmem:[%s2503_s4] sm:$0x1] }
  0x29   :  { %240 = vmatpush.bf16.msra.mxu1 %v1659_v12 }
  0x2b   :  { %362 = vmatpush.bf16.msrb.mxu0 %v1667_v28  ;;  %1688 = vmatpush.bf16.msra.mxu2 %v1667_v28 }
  0x2d   :  { %241 = vmatpush.bf16.msra.mxu1 %v1658_v15 }
  0x2f   :  { %363 = vmatpush.bf16.msrb.mxu0 %v1666_v29  ;;  %1689 = vmatpush.bf16.msra.mxu2 %v1666_v29  ;;  %v613_v29 = vlaneseq }
  0x31   :  { %1489 = vmatmul.msk.bf16.gmra.mxu0 %vm102_vm0, %v1656_v8  ;;  %552 = vmatpush.bf16.msrb.mxu1 %v1884_v0 }
  0x35   :  { %553 = vmatpush.bf16.msrb.mxu1 %v1890_v1 }
  0x41   :  { %1490 = vmatmul.msk.bf16.gmra.mxu0 %vm102_vm0, %v1657_v10 }
  0x69   :  { %v179_v57 = vpop.permute.xlu2 %178 }
  0x72   :  { %v184_v63 = vpop.permute.xlu2 %183 }
  0x7a   :  { %v396_v28 = vpop.permute.xlu2 %395 }
  0x7f   :  { %v301_v44 = vpop.permute.xlu0 %300 }
  0x80   :  { %v291_v45 = vpop.permute.xlu1 %290 }
  0x87   :  { %v306_v46 = vpop.permute.xlu0 %305 }
  0x88   :  { %v296_v47 = vpop.permute.xlu1 %295 }
  0x8e   :  { %v124_v27 = vpop.f32.mrf.mxu0 }
  0x8f   :  { %v169_v48 = vpop.permute.xlu0 %168 }
  0x90   :  { %v174_v53 = vpop.permute.xlu1 %173 }
  0x96   :  { %v126_v30 = vpop.f32.mrf.mxu0 }
  0x97   :  { %v144_v31 = vpack.c.bf16 %v126_v30, %v124_v27  ;;  %v1674_v27 = vld [vmem:[%s2506_s7] sm:$0xff]  ;;  %v2037_v30 = vand.u32 127, %v613_v29 }
  0x99   :  { %242 = vmatmul.bf16.vlgmr.msra.gmra.mxu1 %v144_v31  ;;  %vm615_vm10 = vcmp.lt.s32.totalorder %v2037_v30, 64  ;;  %v2201_v30 = vld [vmem:[%s2511_s12 + $0x18] sm:$0xff] }
  0x9e   :  { %v129_v32 = vpop.f32.mrf.mxu0 }
  0xa6   :  { %v131_v33 = vpop.f32.mrf.mxu0 }
  0xa7   :  { %v145_v34 = vpack.c.bf16 %v131_v33, %v129_v32 }
  0xa9   :  { %247 = vmatmul.bf16.gmra.mxu1 %v145_v34 }
  0xae   :  { %v134_v36 = vpop.f32.mrf.mxu0 }
  0xb6   :  { %v136_v38 = vpop.f32.mrf.mxu0 }
  0xb7   :  { %v265_v39 = vpack.c.bf16 %v136_v38, %v134_v36 }
  0xb9   :  { %364 = vmatmul.bf16.vlgmr.msrb.gmra.mxu0 %v265_v39 }
  0xbe   :  { %v139_v41 = vpop.f32.mrf.mxu0 }
  0xc6   :  { %v141_v42 = vpop.f32.mrf.mxu0 }
  0xc7   :  { %v266_v43 = vpack.c.bf16 %v141_v42, %v139_v41 }
  0xc9   :  { %369 = vmatmul.bf16.vlgmr.msra.gmra.mxu2 %v266_v43 }
 0x116   :  { %v243_v49 = vpop.f32.mrf.mxu1 }
 0x117   :  { %v244_v50 = vadd.f32 %v243_v49, %v169_v48 }
 0x119   :  { %vm253_vm1 = vcmp.ge.f32.partialorder %v244_v50, 0.0  ;;  %v257_v51 = vmul.f32 0.25, %v244_v50 }
 0x11b   :  { %v1986_v52 = vsel %vm253_vm1, %v244_v50, %v257_v51  ;;  %vm963_vm1 = vcmask 1040384  }
 0x11c   :  { %616 = vrot.lane.b32.xlu0 %v1986_v52, %s1788_s3 }
 0x11e   :  { %v245_v54 = vpop.f32.mrf.mxu1 }
 0x11f   :  { %v246_v55 = vadd.f32 %v245_v54, %v174_v53 }
 0x121   :  { %vm254_vm2 = vcmp.ge.f32.partialorder %v246_v55, 0.0  ;;  %v258_v56 = vmul.f32 0.25, %v246_v55 }
 0x123   :  { %v1990_v58 = vsel %vm254_vm2, %v246_v55, %v258_v56 }
 0x124   :  { %618 = vrot.lane.b32.xlu2 %v1990_v58, %s1788_s3  ;;  %v388_v25 = vpack.c.bf16 %v1990_v58, %v1986_v52 }
 0x126   :  { %v248_v59 = vpop.f32.mrf.mxu1 }
 0x127   :  { %v249_v60 = vadd.f32 %v248_v59, %v179_v57 }
 0x129   :  { %vm255_vm3 = vcmp.ge.f32.partialorder %v249_v60, 0.0  ;;  %v259_v61 = vmul.f32 0.25, %v249_v60 }
 0x12b   :  { %v1994_v62 = vsel %vm255_vm3, %v249_v60, %v259_v61 }
 0x12c   :  { %620 = vrot.lane.b32.xlu1 %v1994_v62, %s1788_s3 }
 0x12e   :  { %v250_v2 = vpop.f32.mrf.mxu1 }
 0x12f   :  { %v251_v3 = vadd.f32 %v250_v2, %v184_v63 }
 0x131   :  { %vm256_vm4 = vcmp.ge.f32.partialorder %v251_v3, 0.0  ;;  %v260_v4 = vmul.f32 0.25, %v251_v3 }
 0x133   :  { %v1998_v5 = vsel %vm256_vm4, %v251_v3, %v260_v4 }
 0x134   :  { %622 = vrot.lane.b32.xlu0 %v1998_v5, %s1788_s3  ;;  %v389_v24 = vpack.c.bf16 %v1998_v5, %v1994_v62 }
 0x136   :  { %v365_v6 = vpop.f32.mrf.mxu0 }
 0x137   :  { %v366_v7 = vadd.f32 %v365_v6, %v291_v45 }
 0x139   :  { %vm375_vm5 = vcmp.ge.f32.partialorder %v366_v7, 0.0  ;;  %v379_v8 = vmul.f32 0.25, %v366_v7 }
 0x13b   :  { %v2002_v9 = vsel %vm375_vm5, %v366_v7, %v379_v8 }
 0x13c   :  { %966 = vrot.lane.b32.xlu1 %v2002_v9, %s1788_s3 }
 0x13e   :  { %v367_v10 = vpop.f32.mrf.mxu0 }
 0x13f   :  { %v368_v11 = vadd.f32 %v367_v10, %v296_v47 }
 0x141   :  { %vm376_vm6 = vcmp.ge.f32.partialorder %v368_v11, 0.0  ;;  %v380_v12 = vmul.f32 0.25, %v368_v11 }
 0x143   :  { %v2006_v13 = vsel %vm376_vm6, %v368_v11, %v380_v12 }
 0x144   :  { %968 = vrot.lane.b32.xlu0 %v2006_v13, %s1788_s3  ;;  %v390_v23 = vpack.c.bf16 %v2006_v13, %v2002_v9 }
 0x14c   :  { %v370_v14 = vpop.f32.mrf.mxu2 }
 0x14d   :  { %v371_v15 = vadd.f32 %v370_v14, %v301_v44 }
 0x14f   :  { %vm377_vm7 = vcmp.ge.f32.partialorder %v371_v15, 0.0  ;;  %v381_v16 = vmul.f32 0.25, %v371_v15 }
 0x151   :  { %v2010_v17 = vsel %vm377_vm7, %v371_v15, %v381_v16  ;;  %v2085_v16 = vld [vmem:[%s2510_s11] sm:$0xff] }
 0x152   :  { %970 = vrot.lane.b32.xlu2 %v2010_v17, %s1788_s3 }
 0x154   :  { %v372_v18 = vpop.f32.mrf.mxu2 }
 0x155   :  { %v373_v19 = vadd.f32 %v372_v18, %v306_v46  ;;  %v1677_v18 = vld [vmem:[%s2507_s8 + $0x8] sm:$0xff] }
 0x157   :  { %vm378_vm8 = vcmp.ge.f32.partialorder %v373_v19, 0.0  ;;  %v382_v20 = vmul.f32 0.25, %v373_v19 }
 0x159   :  { %v2014_v21 = vsel %vm378_vm8, %v373_v19, %v382_v20 }
 0x15a   :  { %972 = vrot.lane.b32.xlu1 %v2014_v21, %s1788_s3  ;;  %v391_v22 = vpack.c.bf16 %v2014_v21, %v2010_v17 }
 0x15c   :  { %406 = vmatpush.bf16.msra.mxu3 %v391_v22 }
 0x160   :  { %407 = vmatpush.bf16.msra.mxu3 %v390_v23 }
 0x164   :  { %408 = vmatpush.bf16.msra.mxu3 %v389_v24 }
 0x168   :  { %409 = vmatpush.bf16.msra.mxu3 %v388_v25 }
 0x16b   :  { %1571 = vmatmul.msk.bf16.vlgmr.msra.gmra.mxu3 %vm398_vm9, %v387_v26  ;;  %v2096_v26 = vld [vmem:[%s2510_s11 + $0x8] sm:$0xff] }
 0x16c   :  { %489 = vmatpush.bf16.msrb.mxu3 %v1884_v0 }
 0x170   :  { %490 = vmatpush.bf16.msrb.mxu3 %v1890_v1 }
 0x174   :  { %1690 = vmatpush.bf16.msra.mxu3 %v1884_v0  ;;  %v1675_v0 = vld [vmem:[%s2506_s7 + $0x8] sm:$0xff] }
 0x178   :  { %1691 = vmatpush.bf16.msra.mxu3 %v1890_v1 }
 0x17b   :  { %1580 = vmatmul.msk.bf16.vlgmr.msrb.gmra.mxu3 %vm102_vm0, %v1674_v27 }
 0x17e   :  { %v619_v31 = vpop.permute.xlu2 %618 }
 0x17f   :  { %v2043_v32 = vsel %vm615_vm10, %v1990_v58, %v619_v31 }
 0x184   :  { %630 = vadd.xlane.f32.xlu1 %v2043_v32 }
 0x18b   :  { %1581 = vmatmul.msk.bf16.gmra.mxu3 %vm102_vm0, %v1675_v0 }
 0x18e   :  { %v617_v1 = vpop.permute.xlu0 %616 }
 0x18f   :  { %v2053_v33 = vsel %vm615_vm10, %v1986_v52, %v617_v1 }
 0x190   :  { %628 = vadd.xlane.f32.xlu2 %v2053_v33 }
 0x19b   :  { %1591 = vmatmul.msk.bf16.vlgmr.msra.gmra.mxu3 %vm102_vm0, %v1677_v18  ;;  %v2206_v18 = vld [vmem:[%s2511_s12] sm:$0xff] }
 0x19e   :  { %v621_v34 = vpop.permute.xlu1 %620 }
 0x19f   :  { %v2059_v35 = vsel %vm615_vm10, %v1994_v62, %v621_v34 }
 0x1a0   :  { %632 = vadd.xlane.f32.xlu0 %v2059_v35 }
 0x1a6   :  { %v623_v36 = vpop.permute.xlu0 %622 }
 0x1a7   :  { %v2065_v37 = vsel %vm615_vm10, %v1998_v5, %v623_v36  ;;  %v2103_v36 = vld [vmem:[%s2510_s11 + $0x10] sm:$0xff] }
 0x1a8   :  { %634 = vadd.xlane.f32.xlu2 %v2065_v37 }
 0x1ac   :  { %v2077_v55 = vpop.permute.xlu2 %970 }
 0x1ae   :  { %v2068_v38 = vpop.permute.xlu1 %966 }
 0x1b6   :  { %v2080_v60 = vpop.permute.xlu0 %968 }
 0x1cc   :  { %v973_v39 = vpop.permute.xlu1 %972 }
 0x1cd   :  { %v2073_v40 = vsel %vm615_vm10, %v2014_v21, %v973_v39 }
 0x1ce   :  { %2525 = vst [vmem:[#allocation5_spill] sm:$0xff] %v2073_v40  ;;  %984 = vadd.xlane.f32.xlu2 %v2073_v40 }
 0x1ee   :  { %v411_v41 = vpop.f32.mrf.mxu3 }
 0x1ef   :  { %v412_v42 = vadd.f32 %v411_v41, %v396_v28 }
 0x1f1   :  { %1699 = vtanh.f32 %v412_v42 }
 0x1f6   :  { %v413_v43 = vpop.f32.mrf.mxu3 }
 0x1f7   :  { %v1700_v44 = vpop.eup %1699  ;;  %v631_v11 = vpop.xlane.xlu1 %630 }
 0x1f8   :  { %v417_v45 = vsel %vm416_vm11, %v1700_v44, -inf  ;;  %v637_v14 = vmul.f32 0.0078125, %v631_v11 }
 0x1f9   :  { %v418_v46 = vrot.slane %v417_v45, 4 }
 0x1fb   :  { %v419_v47 = vmax.f32 %v417_v45, %v418_v46 }
 0x1fd   :  { %v420_v48 = vrot.slane %v419_v47, 2 }
 0x1ff   :  { %v421_v49 = vmax.f32 %v419_v47, %v420_v48 }
 0x201   :  { %v422_v50 = vrot.slane %v421_v49, 1 }
 0x203   :  { %v423_v51 = vmax.f32 %v421_v49, %v422_v50  ;;  %v629_v63 = vpop.xlane.xlu2 %628 }
 0x204   :  { %v636_v15 = vmul.f32 0.0078125, %v629_v63 }
 0x205   :  { %v424_v53 = vsub.f32 %v1700_v44, %v423_v51  ;;  %v2130_v51 = vld [vmem:[%s2510_s11 + $0x18] sm:$0xff] }
 0x207   :  { %v425_v54 = vmul.f32 1.442695, %v424_v53 }
 0x209   :  { %1701 = vpow2.f32 %v425_v54 }
 0x20f   :  { %v1702_v56 = vpop.eup %1701 }
 0x210   :  { %v427_v57 = vsel %vm416_vm11, %v1702_v56, 0.0 }
 0x211   :  { %v428_v59 = vrot.slane %v427_v57, 4 }
 0x213   :  { %v429_v61 = vadd.f32 %v428_v59, %v427_v57  ;;  %v633_v7 = vpop.xlane.xlu0 %632  ;;  %v2142_v57 = vsel %vm615_vm10, %v2002_v9, %v2068_v38  ;;  %v2149_v59 = vsel %vm615_vm10, %v2010_v17, %v2077_v55  ;;  %v1676_v55 = vld [vmem:[%s2507_s8] sm:$0xff] }
 0x214   :  { %v638_v12 = vmul.f32 0.0078125, %v633_v7  ;;  %2526 = vst [vmem:[#allocation6_spill] sm:$0xff] %v2149_v59  ;;  %1590 = vmatmul.msk.bf16.vlgmr.msrb.gmra.mxu1 %vm102_vm0, %v1676_v55  ;;  %v2262_v55 = vld [vmem:[%s2505_s6] sm:$0xff] }
 0x215   :  { %v430_v2 = vrot.slane %v429_v61, 2 }
 0x217   :  { %v431_v3 = vadd.f32 %v430_v2, %v429_v61  ;;  %v2156_v61 = vsel %vm615_vm10, %v2006_v13, %v2080_v60 }
 0x219   :  { %v432_v4 = vrot.slane %v431_v3, 1 }
 0x21b   :  { %v433_v6 = vadd.f32 %v432_v4, %v431_v3  ;;  %v635_v8 = vpop.xlane.xlu2 %634 }
 0x21c   :  { %v639_v10 = vmul.f32 0.0078125, %v635_v8 }
 0x21d   :  { %1703 = vrcp.f32 %v433_v6  ;;  %v445_v23 = vand.u32 2147483648, %v433_v6  ;;  %v443_v25 = vand.u32 2147483647, %v433_v6  ;;  %vm439_vm13 = vweird.f32 %v433_v6 }
 0x21e   :  { %668 = vmatpush.msrb.mxu3 %v639_v10  ;;  %775 = vmatpush.msra.mxu0 %v639_v10 }
 0x21f   :  { %v446_v28 = vor.u32 1.1754944e-38, %v445_v23  ;;  %vm444_vm15 = vcmp.eq.f32.partialorder %v443_v25, 8.507059e+37  ;;  %v508_v23 = vld [vmem:[%s2508_s9 + $0x10] sm:$0xff]  ;;  %v509_v25 = vld [vmem:[%s2508_s9 + $0x18] sm:$0xff] }
 0x220   :  { %669 = vmatpush.msrb.mxu3 %v638_v12  ;;  %776 = vmatpush.msra.mxu0 %v638_v12  ;;  %v2190_v12 = vld [vmem:[%s2511_s12 + $0x10] sm:$0xff] }
 0x222   :  { %670 = vmatpush.msrb.mxu3 %v637_v14  ;;  %777 = vmatpush.msra.mxu0 %v637_v14  ;;  %v2195_v14 = vld [vmem:[%s2511_s12 + $0x8] sm:$0xff] }
 0x223   :  { %v1704_v19 = vpop.eup %1703 }
 0x224   :  { %671 = vmatpush.msrb.mxu3 %v636_v15  ;;  %778 = vmatpush.msra.mxu0 %v636_v15  ;;  %v435_v20 = vmul.f32 %v1704_v19, %v433_v6  ;;  %vm440_vm12 = vweird.f32 %v1704_v19 }
 0x225   :  { %1606 = vmatmul.msk.f32.vlgmr.msra.gmra.mxu0 %vm102_vm0, %v2085_v16  ;;  %vm441_vm14 = vmor %vm439_vm13, %vm440_vm12  ;;  %1602 = vmatmul.msk.f32.vlgmr.msrb.gmra.mxu3 %vm102_vm0, %v2262_v55 }
 0x226   :  { %v436_v22 = vsub.f32 1.0, %v435_v20 }
 0x228   :  { %v437_v24 = vmul.f32 %v1704_v19, %v436_v22 }
 0x22a   :  { %v438_v27 = vadd.f32 %v1704_v19, %v437_v24 }
 0x22c   :  { %v442_v29 = vsel %vm441_vm14, %v1704_v19, %v438_v27 }
 0x22d   :  { %1607 = vmatmul.msk.f32.gmra.mxu0 %vm102_vm0, %v2096_v26  ;;  %v447_v31 = vsel %vm444_vm15, %v446_v28, %v442_v29  ;;  %v507_v29 = vld [vmem:[%s2508_s9 + $0x8] sm:$0xff] }
 0x22e   :  { %v448_v0 = vmul.f32 %v1702_v56, %v447_v31 }
 0x230   :  { %v449_v1 = vperm.slane %v448_v0, 0  ;;  %v454_v34 = vperm.slane %v448_v0, 1 }
 0x232   :  { %v453_v39 = vmul.f32 %v449_v1, %v1998_v5  ;;  %v458_v41 = vmul.f32 %v454_v34, %v2014_v21  ;;  %v452_v42 = vmul.f32 %v449_v1, %v1994_v62  ;;  %v457_v43 = vmul.f32 %v454_v34, %v2010_v17 }
 0x233   :  { %v451_v44 = vmul.f32 %v449_v1, %v1990_v58  ;;  %v456_v45 = vmul.f32 %v454_v34, %v2006_v13  ;;  %v450_v49 = vmul.f32 %v449_v1, %v1986_v52  ;;  %v455_v50 = vmul.f32 %v454_v34, %v2002_v9  ;;  %v868_v1 = vld [vmem:[%s2513_s14 + $0x18] sm:$0xff]  ;;  %v2226_v34 = vld [vmem:[%s2512_s13] sm:$0xff] }
 0x234   :  { %v2111_v46 = vadd.f32 %v458_v41, %v453_v39  ;;  %v2113_v47 = vadd.f32 %v457_v43, %v452_v42  ;;  %v506_v39 = vld [vmem:[%s2508_s9] sm:$0xff]  ;;  %v2236_v41 = vld [vmem:[%s2512_s13 + $0x8] sm:$0xff]  ;;  %v867_v42 = vld [vmem:[%s2513_s14 + $0x10] sm:$0xff] }
 0x235   :  { %1608 = vmatmul.msk.f32.gmra.mxu0 %vm102_vm0, %v2103_v36  ;;  %v2117_v48 = vadd.f32 %v456_v45, %v451_v44  ;;  %v2132_v53 = vadd.f32 %v455_v50, %v450_v49  ;;  %v2246_v45 = vld [vmem:[%s2512_s13 + $0x10] sm:$0xff] }
 0x236   :  { %1210 = vrot.lane.b32.xlu2 %v2111_v46, %s1788_s3  ;;  %1208 = vrot.lane.b32.xlu0 %v2113_v47, %s1788_s3 }
 0x237   :  { %1206 = vrot.lane.b32.xlu1 %v2117_v48, %s1788_s3 }
 0x23d   :  { %1609 = vmatmul.msk.f32.gmra.mxu0 %vm102_vm0, %v2130_v51 }
 0x23e   :  { %1204 = vrot.lane.b32.xlu0 %v2132_v53, %s1788_s3 }
 0x241   :  { %v985_v54 = vpop.xlane.xlu2 %984 }
 0x242   :  { %v989_v56 = vmul.f32 0.0078125, %v985_v54 }
 0x244   :  { %1002 = vmatpush.msra.mxu3 %v989_v56  ;;  %1079 = vmatpush.msrb.mxu0 %v989_v56 }
 0x25f   :  { %978 = vadd.xlane.f32.xlu2 %v2142_v57 }
 0x261   :  { %982 = vadd.xlane.f32.xlu1 %v2149_v59 }
 0x268   :  { %980 = vadd.xlane.f32.xlu0 %v2156_v61 }
 0x290   :  { %v1211_v38 = vpop.permute.xlu2 %1210 }
 0x291   :  { %v2162_v63 = vsel %vm615_vm10, %v2111_v46, %v1211_v38  ;;  %v2253_v38 = vld [vmem:[%s2512_s13 + $0x18] sm:$0xff]  ;;  %s1790_s13 = smov 4  }
 0x292   :  { %1222 = vadd.xlane.f32.xlu1 %v2162_v63 }
 0x2a2   :  { %v780_v2 = vpop.f32.mrf.mxu0 }
 0x2a3   :  { %v781_v24 = vadd.f32 %v780_v2, %v2206_v18  ;;  %v2272_v2 = vpop.f32.mrf.mxu3 }
 0x2a8   :  { %v1209_v3 = vpop.permute.xlu0 %1208 }
 0x2a9   :  { %v1207_v60 = vpop.permute.xlu1 %1206  ;;  %v2172_v4 = vsel %vm615_vm10, %v2113_v47, %v1209_v3 }
 0x2aa   :  { %v783_v6 = vpop.f32.mrf.mxu0  ;;  %v2177_v7 = vsel %vm615_vm10, %v2117_v48, %v1207_v60  ;;  %1220 = vadd.xlane.f32.xlu0 %v2172_v4 }
 0x2ab   :  { %1218 = vadd.xlane.f32.xlu2 %v2177_v7  ;;  %v784_v20 = vadd.f32 %v783_v6, %v2195_v14  ;;  %v2274_v3 = vpop.f32.mrf.mxu3 }
 0x2b0   :  { %v1205_v8 = vpop.permute.xlu0 %1204 }
 0x2b1   :  { %v2184_v10 = vsel %vm615_vm10, %v2132_v53, %v1205_v8 }
 0x2b2   :  { %v786_v11 = vpop.f32.mrf.mxu0  ;;  %1216 = vadd.xlane.f32.xlu1 %v2184_v10 }
 0x2b3   :  { %v787_v15 = vadd.f32 %v786_v11, %v2190_v12  ;;  %v2276_v8 = vpop.f32.mrf.mxu3 }
 0x2b5   :  { %1705 = vtanh.f32 %v787_v15 }
 0x2ba   :  { %v789_v19 = vpop.f32.mrf.mxu0 }
 0x2bb   :  { %v790_v22 = vadd.f32 %v789_v19, %v2201_v30  ;;  %v1706_v27 = vpop.eup %1705  ;;  %v2278_v11 = vpop.f32.mrf.mxu3 }
 0x2bd   :  { %1707 = vtanh.f32 %v790_v22 }
 0x2be   :  { %522 = vperm.xlu0 %1696, %v508_v23   ;;  %1709 = vtanh.f32 %v784_v20 }
 0x2bf   :  { %1711 = vtanh.f32 %v781_v24 }
 0x2c3   :  { %v1708_v28 = vpop.eup %1707  ;;  %527 = vperm.xlu2 %1698, %v509_v25   ;;  %v560_v23 = vpop.f32.mrf.mxu3 }
 0x2c4   :  { %824 = vmatpush.msra.mxu1 %v1708_v28  ;;  %v1710_v31 = vpop.eup %1709 }
 0x2c5   :  { %v1712_v0 = vpop.eup %1711 }
 0x2c6   :  { %825 = vmatpush.msra.mxu1 %v1706_v27  ;;  %517 = vperm.xlu0 %1696, %v507_v29  }
 0x2c8   :  { %826 = vmatpush.msra.mxu1 %v1710_v31  ;;  %v555_v31 = vpop.f32.mrf.mxu1 }
 0x2ca   :  { %827 = vmatpush.msra.mxu1 %v1712_v0 }
 0x2cb   :  { %886 = vperm.xlu2 %1698, %v868_v1   ;;  %1610 = vmatmul.msk.f32.vlgmr.msra.gmra.mxu1 %vm102_vm0, %v2226_v34  ;;  %v562_v27 = vpop.f32.mrf.mxu3 }
 0x2cc   :  { %512 = vperm.xlu1 %1697, %v506_v39  }
 0x2d2   :  { %v979_v49 = vpop.xlane.xlu2 %978 }
 0x2d3   :  { %1611 = vmatmul.msk.f32.gmra.mxu1 %vm102_vm0, %v2236_v41  ;;  %v986_v56 = vmul.f32 0.0078125, %v979_v49 }
 0x2d4   :  { %v983_v43 = vpop.xlane.xlu1 %982  ;;  %881 = vperm.xlu1 %1697, %v867_v42  }
 0x2d5   :  { %v988_v44 = vmul.f32 0.0078125, %v983_v43  ;;  %v557_v43 = vpop.f32.mrf.mxu1 }
 0x2d7   :  { %1003 = vmatpush.msra.mxu3 %v988_v44  ;;  %1080 = vmatpush.msrb.mxu0 %v988_v44 }
 0x2db   :  { %1612 = vmatmul.msk.f32.gmra.mxu1 %vm102_vm0, %v2246_v45  ;;  %v981_v50 = vpop.xlane.xlu0 %980 }
 0x2dc   :  { %v987_v54 = vmul.f32 0.0078125, %v981_v50 }
 0x2de   :  { %1004 = vmatpush.msra.mxu3 %v987_v54  ;;  %1081 = vmatpush.msrb.mxu0 %v987_v54 }
 0x2e0   :  { %1005 = vmatpush.msra.mxu3 %v986_v56  ;;  %1082 = vmatpush.msrb.mxu0 %v986_v56 }
 0x2e1   :  { %1628 = vmatmul.msk.f32.vlgmr.msrb.gmra.mxu0 %vm102_vm0, %v2085_v16 }
 0x2e3   :  { %1613 = vmatmul.msk.f32.gmra.mxu1 %vm102_vm0, %v2253_v38 }
 0x2e9   :  { %1629 = vmatmul.msk.f32.gmra.mxu0 %vm102_vm0, %v2096_v26 }
 0x2f1   :  { %1630 = vmatmul.msk.f32.gmra.mxu0 %vm102_vm0, %v2103_v36 }
 0x2f9   :  { %1631 = vmatmul.msk.f32.gmra.mxu0 %vm102_vm0, %v2130_v51 }
 0x305   :  { %v1223_v60 = vpop.xlane.xlu1 %1222 }
 0x306   :  { %v1227_v6 = vmul.f32 0.0078125, %v1223_v60 }
 0x308   :  { %1240 = vmatpush.msrb.mxu3 %v1227_v6  ;;  %1317 = vmatpush.msra.mxu0 %v1227_v6 }
 0x31d   :  { %v1221_v15 = vpop.xlane.xlu0 %1220 }
 0x31e   :  { %v1219_v19 = vpop.xlane.xlu2 %1218  ;;  %v1226_v20 = vmul.f32 0.0078125, %v1221_v15  ;;  %v1678_v15 = vld [vmem:[%s2509_s10] sm:$0xff] }
 0x31f   :  { %v1225_v22 = vmul.f32 0.0078125, %v1219_v19 }
 0x320   :  { %1241 = vmatpush.msrb.mxu3 %v1226_v20  ;;  %1318 = vmatpush.msra.mxu0 %v1226_v20 }
 0x322   :  { %1242 = vmatpush.msrb.mxu3 %v1225_v22  ;;  %1319 = vmatpush.msra.mxu0 %v1225_v22  ;;  %v865_v22 = vld [vmem:[%s2513_s14] sm:$0xff] }
 0x325   :  { %v1217_v24 = vpop.xlane.xlu1 %1216 }
 0x326   :  { %v1224_v25 = vmul.f32 0.0078125, %v1217_v24  ;;  %v528_v28 = vpop.permute.xlu2 %527 }
 0x327   :  { %v563_v29 = vadd.f32 %v562_v27, %v528_v28 }
 0x328   :  { %1243 = vmatpush.msrb.mxu3 %v1224_v25  ;;  %1320 = vmatpush.msra.mxu0 %v1224_v25  ;;  %v866_v25 = vld [vmem:[%s2513_s14 + $0x8] sm:$0xff] }
 0x329   :  { %1642 = vmatmul.msk.f32.vlgmr.msra.gmra.mxu0 %vm102_vm0, %v2085_v16  ;;  %1713 = vtanh.f32 %v563_v29 }
 0x32f   :  { %v1714_v39 = vpop.eup %1713 }
 0x330   :  { %v523_v0 = vpop.permute.xlu0 %522 }
 0x331   :  { %v561_v1 = vadd.f32 %v560_v23, %v523_v0  ;;  %1643 = vmatmul.msk.f32.gmra.mxu0 %vm102_vm0, %v2096_v26 }
 0x333   :  { %1715 = vtanh.f32 %v561_v1 }
 0x338   :  { %v518_v44 = vpop.permute.xlu0 %517 }
 0x339   :  { %v1716_v42 = vpop.eup %1715  ;;  %1644 = vmatmul.msk.f32.gmra.mxu0 %vm102_vm0, %v2103_v36  ;;  %v558_v16 = vadd.f32 %v557_v43, %v518_v44 }
 0x33a   :  { %v574_v49 = vpack.c.bf16 %v1714_v39, %v1716_v42 }
 0x33b   :  { %1717 = vtanh.f32 %v558_v16  ;;  %v642_v16 = vld [vmem:[%s2505_s6 + $0x10] sm:$0xff] }
 0x33c   :  { %597 = vmatpush.bf16.msrb.mxu2 %v574_v49  ;;  %v641_v49 = vld [vmem:[%s2505_s6 + $0x8] sm:$0xff] }
 0x33d   :  { %1603 = vmatmul.msk.f32.gmra.mxu3 %vm102_vm0, %v641_v49 }
 0x33e   :  { %v513_v50 = vpop.permute.xlu1 %512 }
 0x33f   :  { %v556_v54 = vadd.f32 %v555_v31, %v513_v50  ;;  %v643_v50 = vld [vmem:[%s2505_s6 + $0x18] sm:$0xff] }
 0x341   :  { %1719 = vtanh.f32 %v556_v54  ;;  %1645 = vmatmul.msk.f32.gmra.mxu0 %vm102_vm0, %v2130_v51  ;;  %v1718_v26 = vpop.eup %1717  ;;  %v1679_v51 = vld [vmem:[%s2509_s10 + $0x8] sm:$0xff] }
 0x345   :  { %1604 = vmatmul.msk.f32.gmra.mxu3 %vm102_vm0, %v642_v16 }
 0x347   :  { %v1720_v56 = vpop.eup %1719 }
 0x348   :  { %v829_v60 = vpop.f32.mrf.mxu1  ;;  %v573_v6 = vpack.c.bf16 %v1718_v26, %v1720_v56 }
 0x349   :  { %843 = vperm.xlu0 %1696, %v829_v60  }
 0x34a   :  { %598 = vmatpush.bf16.msrb.mxu2 %v573_v6 }
 0x34d   :  { %1600 = vmatmul.msk.bf16.vlgmr.msrb.gmra.mxu2 %vm102_vm0, %v1678_v15  ;;  %1605 = vmatmul.msk.f32.gmra.mxu3 %vm102_vm0, %v643_v50 }
 0x350   :  { %v832_v36 = vpop.f32.mrf.mxu1 }
 0x351   :  { %848 = vperm.xlu1 %1697, %v832_v36  }
 0x355   :  { %1624 = vmatmul.msk.f32.vlgmr.msra.gmra.mxu3 %vm102_vm0, %v2262_v55 }
 0x358   :  { %v835_v19 = vpop.f32.mrf.mxu1 }
 0x359   :  { %853 = vperm.xlu2 %1698, %v835_v19  }
 0x35d   :  { %1601 = vmatmul.msk.bf16.gmra.mxu2 %vm102_vm0, %v1679_v51  ;;  %1625 = vmatmul.msk.f32.gmra.mxu3 %vm102_vm0, %v641_v49 }
 0x35e   :  { %v1084_v20 = vpop.f32.mrf.mxu0 }
 0x35f   :  { %v1085_v1 = vadd.f32 %v1084_v20, %v2206_v18 }
 0x360   :  { %v838_v23 = vpop.f32.mrf.mxu1 }
 0x361   :  { %871 = vperm.xlu2 %1698, %v865_v22   ;;  %858 = vperm.xlu0 %1696, %v838_v23   ;;  %v2347_v22 = vpop.permute.xlu2 %886 }
 0x365   :  { %1626 = vmatmul.msk.f32.gmra.mxu3 %vm102_vm0, %v642_v16 }
 0x366   :  { %v1087_v24 = vpop.f32.mrf.mxu0 }
 0x367   :  { %v1088_v31 = vadd.f32 %v1087_v24, %v2195_v14  ;;  %v2350_v24 = vpop.permute.xlu1 %881 }
 0x369   :  { %876 = vperm.xlu0 %1696, %v866_v25  }
 0x36d   :  { %1627 = vmatmul.msk.f32.gmra.mxu3 %vm102_vm0, %v643_v50 }
 0x36e   :  { %v1090_v27 = vpop.f32.mrf.mxu0 }
 0x36f   :  { %v1091_v28 = vadd.f32 %v1090_v27, %v2190_v12 }
 0x371   :  { %1721 = vtanh.f32 %v1091_v28 }
 0x375   :  { %1638 = vmatmul.msk.f32.vlgmr.msrb.gmra.mxu3 %vm102_vm0, %v2262_v55 }
 0x376   :  { %v1093_v29 = vpop.f32.mrf.mxu0 }
 0x377   :  { %v1094_v0 = vadd.f32 %v1093_v29, %v2201_v30  ;;  %v1722_v39 = vpop.eup %1721 }
 0x379   :  { %1723 = vtanh.f32 %v1094_v0 }
 0x37a   :  { %1725 = vtanh.f32 %v1088_v31 }
 0x37b   :  { %1727 = vtanh.f32 %v1085_v1 }
 0x37d   :  { %1639 = vmatmul.msk.f32.gmra.mxu3 %vm102_vm0, %v641_v49 }
 0x37f   :  { %v1724_v42 = vpop.eup %1723 }
 0x380   :  { %1112 = vmatpush.msrb.mxu1 %v1724_v42  ;;  %v1726_v43 = vpop.eup %1725 }
 0x381   :  { %v1728_v44 = vpop.eup %1727 }
 0x382   :  { %1113 = vmatpush.msrb.mxu1 %v1722_v39 }
 0x384   :  { %1114 = vmatpush.msrb.mxu1 %v1726_v43 }
 0x385   :  { %1640 = vmatmul.msk.f32.gmra.mxu3 %vm102_vm0, %v642_v16 }
 0x386   :  { %1115 = vmatpush.msrb.mxu1 %v1728_v44 }
 0x387   :  { %1632 = vmatmul.msk.f32.vlgmr.msrb.gmra.mxu1 %vm102_vm0, %v2226_v34 }
 0x38d   :  { %1641 = vmatmul.msk.f32.gmra.mxu3 %vm102_vm0, %v643_v50 }
 0x38f   :  { %1633 = vmatmul.msk.f32.gmra.mxu1 %vm102_vm0, %v2236_v41 }
 0x397   :  { %1634 = vmatmul.msk.f32.gmra.mxu1 %vm102_vm0, %v2246_v45 }
 0x39f   :  { %1635 = vmatmul.msk.f32.gmra.mxu1 %vm102_vm0, %v2253_v38 }
 0x3a6   :  { %v1322_v54 = vpop.f32.mrf.mxu0 }
 0x3a7   :  { %v1323_v19 = vadd.f32 %v1322_v54, %v2206_v18 }
 0x3ae   :  { %v1325_v26 = vpop.f32.mrf.mxu0 }
 0x3af   :  { %v1326_v36 = vadd.f32 %v1325_v26, %v2195_v14 }
 0x3b3   :  { %v854_v25 = vpop.permute.xlu2 %853 }
 0x3b6   :  { %v1328_v56 = vpop.f32.mrf.mxu0 }
 0x3b7   :  { %v1329_v6 = vadd.f32 %v1328_v56, %v2190_v12  ;;  %v2375_v56 = vld [vmem:[%s2514_s15] sm:$0xff] }
 0x3bb   :  { %v844_v18 = vpop.permute.xlu0 %843  ;;  %v2369_v43 = vpop.permute.xlu2 %871 }
 0x3be   :  { %v1331_v60 = vpop.f32.mrf.mxu0 }
 0x3bf   :  { %v1332_v15 = vadd.f32 %v1331_v60, %v2201_v30 }
 0x3c1   :  { %1729 = vtanh.f32 %v1332_v15 }
 0x3c2   :  { %1731 = vtanh.f32 %v1329_v6  ;;  %v2382_v6 = vld [vmem:[%s2514_s15 + $0x8] sm:$0xff] }
 0x3c3   :  { %1733 = vtanh.f32 %v1326_v36  ;;  %v849_v28 = vpop.permute.xlu1 %848  ;;  %v673_v36 = vpop.f32.mrf.mxu3 }
 0x3c4   :  { %1735 = vtanh.f32 %v1323_v19 }
 0x3c7   :  { %v1730_v51 = vpop.eup %1729 }
 0x3c8   :  { %1350 = vmatpush.msra.mxu1 %v1730_v51  ;;  %v1732_v20 = vpop.eup %1731 }
 0x3c9   :  { %v1734_v12 = vpop.eup %1733 }
 0x3ca   :  { %1351 = vmatpush.msra.mxu1 %v1732_v20  ;;  %v1736_v30 = vpop.eup %1735 }
 0x3cb   :  { %v676_v51 = vpop.f32.mrf.mxu3 }
 0x3cc   :  { %1352 = vmatpush.msra.mxu1 %v1734_v12 }
 0x3ce   :  { %1353 = vmatpush.msra.mxu1 %v1736_v30 }
 0x3cf   :  { %1646 = vmatmul.msk.f32.vlgmr.msra.gmra.mxu1 %vm102_vm0, %v2226_v34 }
 0x3d0   :  { %v2340_v14 = vpop.f32.mrf.mxu2 }
 0x3d1   :  { %v861_v0 = vadd.f32 %v844_v18, %v2340_v14 }
 0x3d3   :  { %v859_v23 = vpop.permute.xlu0 %858  ;;  %v679_v12 = vpop.f32.mrf.mxu3 }
 0x3d7   :  { %1647 = vmatmul.msk.f32.gmra.mxu1 %vm102_vm0, %v2236_v41 }
 0x3d8   :  { %v2345_v55 = vpop.f32.mrf.mxu2 }
 0x3d9   :  { %v862_v1 = vadd.f32 %v849_v28, %v2345_v55 }
 0x3db   :  { %v2359_v41 = vpop.permute.xlu0 %876  ;;  %v682_v30 = vpop.f32.mrf.mxu3 }
 0x3dc   :  { %v890_v39 = vadd.f32 %v2359_v41, %v862_v1 }
 0x3df   :  { %1648 = vmatmul.msk.f32.gmra.mxu1 %vm102_vm0, %v2246_v45 }
 0x3e0   :  { %v2354_v34 = vpop.f32.mrf.mxu2 }
 0x3e1   :  { %v863_v27 = vadd.f32 %v854_v25, %v2354_v34 }
 0x3e3   :  { %v891_v29 = vadd.f32 %v2350_v24, %v863_v27  ;;  %v1007_v18 = vpop.f32.mrf.mxu3 }
 0x3e5   :  { %1737 = vtanh.f32 %v891_v29 }
 0x3e7   :  { %1649 = vmatmul.msk.f32.gmra.mxu1 %vm102_vm0, %v2253_v38  ;;  %v889_v38 = vadd.f32 %v2369_v43, %v861_v0  ;;  %v610_v0 = vld [vmem:[%s2515_s16] sm:$0x1] }
 0x3e8   :  { %v2362_v31 = vpop.f32.mrf.mxu2 }
 0x3e9   :  { %v864_v45 = vadd.f32 %v859_v23, %v2362_v31 }
 0x3eb   :  { %v892_v42 = vadd.f32 %v2347_v22, %v864_v45  ;;  %v1738_v44 = vpop.eup %1737  ;;  %v1010_v23 = vpop.f32.mrf.mxu3 }
 0x3ed   :  { %1739 = vtanh.f32 %v892_v42 }
 0x3ee   :  { %1741 = vtanh.f32 %v890_v39 }
 0x3ef   :  { %1743 = vtanh.f32 %v889_v38  ;;  %v611_v38 = vld [vmem:[%s2515_s16 + $0x1] sm:$0x1] }
 0x3f3   :  { %v1740_v49 = vpop.eup %1739  ;;  %v1013_v27 = vpop.f32.mrf.mxu3 }
 0x3f4   :  { %v902_v16 = vpack.c.bf16 %v1740_v49, %v1738_v44  ;;  %v1742_v50 = vpop.eup %1741  ;;  %v612_v44 = vld [vmem:[%s2515_s16 + $0x2] sm:$0x1]  ;;  %s1789_s16 = smov [#allocation2]  }
 0x3f5   :  { %v1744_v54 = vpop.eup %1743  ;;  %s1449_s5 = sshll.u32 %s1789_s16, 4  ;;  %s1450_s5 = int_to_ptr.vmem [resolvable:$true] %s1449_s5 }
 0x3f6   :  { %925 = vmatpush.bf16.msra.mxu2 %v902_v16  ;;  %v901_v26 = vpack.c.bf16 %v1742_v50, %v1744_v54 }
 0x3fa   :  { %926 = vmatpush.bf16.msra.mxu2 %v901_v26 }
 0x3fb   :  { %v1016_v29 = vpop.f32.mrf.mxu3 }
 0x3fd   :  { %1622 = vmatmul.msk.bf16.vlgmr.msra.gmra.mxu2 %vm102_vm0, %v2375_v56 }
 0x403   :  { %v1245_v45 = vpop.f32.mrf.mxu3 }
 0x404   :  { %v1117_v60 = vpop.f32.mrf.mxu1 }
 0x405   :  { %1131 = vperm.xlu0 %1696, %v1117_v60  }
 0x40b   :  { %v1248_v42 = vpop.f32.mrf.mxu3 }
 0x40c   :  { %v1120_v15 = vpop.f32.mrf.mxu1 }
 0x40d   :  { %1623 = vmatmul.msk.bf16.gmra.mxu2 %vm102_vm0, %v2382_v6 }
 0x413   :  { %v1251_v16 = vpop.f32.mrf.mxu3 }
 0x414   :  { %v1123_v19 = vpop.f32.mrf.mxu1 }
 0x415   :  { %1141 = vperm.xlu1 %1697, %v1123_v19  }
 0x41b   :  { %v1254_v19 = vpop.f32.mrf.mxu3 }
 0x41c   :  { %v1126_v20 = vpop.f32.mrf.mxu1 }
 0x41d   :  { %1136 = vperm.xlu1 %1697, %v1120_v15   ;;  %1146 = vperm.xlu2 %1698, %v1126_v20  }
 0x44c   :  { %v1355_v25 = vpop.f32.mrf.mxu1 }
 0x44d   :  { %1369 = vperm.xlu1 %1697, %v1355_v25  }
 0x454   :  { %v1358_v28 = vpop.f32.mrf.mxu1 }
 0x455   :  { %692 = vperm.xlu1 %1697, %v676_v51  }
 0x45c   :  { %v1361_v1 = vpop.f32.mrf.mxu1 }
 0x45d   :  { %720 = vperm.xlu1 %1697, %v610_v0   ;;  %1379 = vperm.xlu2 %1698, %v1361_v1  }
 0x464   :  { %v1364_v39 = vpop.f32.mrf.mxu1 }
 0x465   :  { %1021 = vperm.xlu1 %1697, %v1007_v18   ;;  %1374 = vperm.xlu2 %1698, %v1358_v28  }
 0x466   :  { %1384 = vperm.xlu0 %1696, %v1364_v39  }
 0x46d   :  { %697 = vperm.xlu2 %1698, %v679_v12   ;;  %1264 = vperm.xlu1 %1697, %v1248_v42  }
 0x46e   :  { %687 = vperm.xlu0 %1696, %v673_v36  }
 0x475   :  { %739 = vperm.xlu2 %1698, %v611_v38   ;;  %1036 = vperm.xlu1 %1697, %v1016_v29  }
 0x476   :  { %702 = vperm.xlu0 %1696, %v682_v30  }
 0x477   :  { %v1147_v49 = vpop.permute.xlu2 %1146  ;;  %v1132_v60 = vpop.permute.xlu0 %1131 }
 0x478   :  { %v1152_v50 = vadd.f32 %v1147_v49, %v2362_v31  ;;  %v1149_v51 = vadd.f32 %v1132_v60, %v2340_v14  ;;  %v725_v60 = vmul.f32 %v2043_v32, %v2274_v3 }
 0x47a   :  { %v1156_v54 = vadd.f32 %v1152_v50, %v2347_v22  ;;  %v1153_v20 = vadd.f32 %v1149_v51, %v2369_v43 }
 0x47c   :  { %1745 = vtanh.f32 %v1156_v54 }
 0x47d   :  { %1026 = vperm.xlu2 %1698, %v1010_v23  }
 0x47e   :  { %953 = vperm.xlu0 %1696, %v612_v44  }
 0x480   :  { %v928_v1 = vpop.f32.mrf.mxu2 }
 0x482   :  { %v1746_v18 = vpop.eup %1745 }
 0x485   :  { %1031 = vperm.xlu2 %1698, %v1013_v27  }
 0x486   :  { %1259 = vperm.xlu0 %1696, %v1245_v45  }
 0x487   :  { %v1142_v26 = vpop.permute.xlu1 %1141 }
 0x488   :  { %v1151_v15 = vadd.f32 %v1142_v26, %v2354_v34  ;;  %v930_v38 = vpop.f32.mrf.mxu2  ;;  %v1054_v26 = vmul.f32 %v2156_v61, %v2274_v3 }
 0x48a   :  { %v1155_v36 = vadd.f32 %v1151_v15, %v2350_v24  ;;  %v1053_v15 = vmul.f32 %v2142_v57, %v2272_v2 }
 0x48c   :  { %1747 = vtanh.f32 %v1155_v36  ;;  %v1055_v36 = vmul.f32 %v2149_v59, %v2276_v8 }
 0x48d   :  { %1274 = vperm.xlu2 %1698, %v1254_v19   ;;  %1749 = vtanh.f32 %v1153_v20  ;;  %v939_v19 = vmul.f32 %v930_v38, %v2043_v32  ;;  %v724_v20 = vmul.f32 %v2053_v33, %v2272_v2 }
 0x48e   :  { %1269 = vperm.xlu0 %1696, %v1251_v16  }
 0x48f   :  { %v1137_v12 = vpop.permute.xlu1 %1136  ;;  %v728_v32 = vadd.f32 %v725_v60, %v724_v20 }
 0x490   :  { %v1150_v30 = vadd.f32 %v1137_v12, %v2345_v55  ;;  %v933_v16 = vpop.f32.mrf.mxu2  ;;  %v726_v12 = vmul.f32 %v2059_v35, %v2276_v8 }
 0x492   :  { %v1748_v23 = vpop.eup %1747  ;;  %v1154_v25 = vadd.f32 %v1150_v30, %v2359_v41  ;;  %v1057_v30 = vadd.f32 %v1054_v26, %v1053_v15 }
 0x493   :  { %v1162_v27 = vpack.c.bf16 %v1746_v18, %v1748_v23  ;;  %v1750_v28 = vpop.eup %1749  ;;  %v1056_v23 = vmul.f32 %v2073_v40, %v2278_v11 }
 0x494   :  { %1751 = vtanh.f32 %v1154_v25  ;;  %v938_v25 = vmul.f32 %v928_v1, %v2053_v33  ;;  %v1058_v38 = vadd.f32 %v1057_v30, %v1055_v36  ;;  %v729_v33 = vadd.f32 %v728_v32, %v726_v12 }
 0x495   :  { %1169 = vmatpush.bf16.msrb.mxu2 %v1162_v27  ;;  %v940_v27 = vmul.f32 %v933_v16, %v2059_v35 }
 0x496   :  { %v942_v26 = vadd.f32 %v939_v19, %v938_v25  ;;  %v1059_v1 = vadd.f32 %v1058_v38, %v1056_v23 }
 0x498   :  { %v935_v18 = vpop.f32.mrf.mxu2 }
 0x499   :  { %v941_v15 = vmul.f32 %v935_v18, %v2065_v37 }
 0x49a   :  { %v1752_v29 = vpop.eup %1751 }
 0x49b   :  { %v1161_v0 = vpack.c.bf16 %v1752_v29, %v1750_v28 }
 0x49d   :  { %1170 = vmatpush.bf16.msrb.mxu2 %v1161_v0 }
 0x4a0   :  { %1636 = vmatmul.msk.bf16.vlgmr.msrb.gmra.mxu2 %vm102_vm0, %v2375_v56 }
 0x4b0   :  { %1637 = vmatmul.msk.bf16.gmra.mxu2 %vm102_vm0, %v2382_v6 }
 0x4b7   :  { %v1380_v45 = vpop.permute.xlu2 %1379 }
 0x4b8   :  { %v1389_v51 = vadd.f32 %v1380_v45, %v2354_v34  ;;  %v727_v34 = vmul.f32 %v2065_v37, %v2278_v11  ;;  %v1060_v37 = vrot.slane %v1059_v1, 4 }
 0x4ba   :  { %v1393_v40 = vadd.f32 %v1389_v51, %v2350_v24  ;;  %v730_v16 = vadd.f32 %v729_v33, %v727_v34  ;;  %v1061_v20 = vadd.f32 %v1060_v37, %v1059_v1 }
 0x4bc   :  { %1753 = vtanh.f32 %v1393_v40  ;;  %v731_v36 = vrot.slane %v730_v16, 4  ;;  %v1062_v34 = vrot.slane %v1061_v20, 2 }
 0x4be   :  { %v732_v40 = vadd.f32 %v731_v36, %v730_v16  ;;  %v1063_v33 = vadd.f32 %v1062_v34, %v1061_v20 }
 0x4bf   :  { %v1370_v39 = vpop.permute.xlu1 %1369  ;;  %v1375_v42 = vpop.permute.xlu2 %1374 }
 0x4c0   :  { %v1387_v28 = vadd.f32 %v1370_v39, %v2340_v14  ;;  %v1388_v29 = vadd.f32 %v1375_v42, %v2345_v55  ;;  %v943_v14 = vadd.f32 %v942_v26, %v940_v27 }
 0x4c2   :  { %v1391_v39 = vadd.f32 %v1387_v28, %v2369_v43  ;;  %v1392_v60 = vadd.f32 %v1388_v29, %v2359_v41  ;;  %v944_v42 = vadd.f32 %v943_v14, %v941_v15  ;;  %v1754_v43 = vpop.eup %1753 }
 0x4c4   :  { %v945_v19 = vrot.slane %v944_v42, 4 }
 0x4c6   :  { %v946_v23 = vadd.f32 %v945_v19, %v944_v42 }
 0x4c7   :  { %v693_v44 = vpop.permute.xlu1 %692  ;;  %v2407_v49 = vpop.permute.xlu2 %697 }
 0x4c8   :  { %v706_v30 = vmul.f32 %v693_v44, %v1990_v58 }
 0x4cf   :  { %v2409_v50 = vpop.permute.xlu1 %720  ;;  %v2411_v54 = vpop.permute.xlu2 %739 }
 0x4d7   :  { %v1022_v0 = vpop.permute.xlu1 %1021  ;;  %v1027_v45 = vpop.permute.xlu2 %1026 }
 0x4d8   :  { %v1385_v59 = vpop.permute.xlu0 %1384  ;;  %v1039_v41 = vmul.f32 %v1022_v0, %v2002_v9  ;;  %v733_v9 = vrot.slane %v732_v40, 2 }
 0x4d9   :  { %v1390_v35 = vadd.f32 %v1385_v59, %v2362_v31 }
 0x4db   :  { %v1394_v55 = vadd.f32 %v1390_v35, %v2347_v22  ;;  %v1040_v22 = vmul.f32 %v1027_v45, %v2006_v13  ;;  %v947_v13 = vrot.slane %v946_v23, 2 }
 0x4dd   :  { %1755 = vtanh.f32 %v1394_v55  ;;  %v1043_v29 = vadd.f32 %v1040_v22, %v1039_v41  ;;  %v948_v14 = vadd.f32 %v947_v13, %v946_v23 }
 0x4de   :  { %1757 = vtanh.f32 %v1391_v39 }
 0x4df   :  { %1759 = vtanh.f32 %v1392_v60  ;;  %v2441_v24 = vpop.permute.xlu1 %1264  ;;  %v1032_v31 = vpop.permute.xlu2 %1031  ;;  %v1064_v60 = vrot.slane %v1063_v33, 1  ;;  %v949_v36 = vrot.slane %v948_v14, 1 }
 0x4e0   :  { %v688_v59 = vpop.permute.xlu0 %687  ;;  %v1041_v25 = vmul.f32 %v1032_v31, %v2010_v17  ;;  %v1291_v17 = vmul.f32 %v2184_v10, %v2272_v2 }
 0x4e1   :  { %v705_v51 = vmul.f32 %v688_v59, %v1986_v52  ;;  %v707_v52 = vmul.f32 %v2407_v49, %v1994_v62  ;;  %v1292_v62 = vmul.f32 %v2177_v7, %v2274_v3  ;;  %v734_v49 = vadd.f32 %v733_v9, %v732_v40 }
 0x4e2   :  { %v1044_v45 = vadd.f32 %v1043_v29, %v1041_v25  ;;  %v1065_v31 = vadd.f32 %v1064_v60, %v1063_v33 }
 0x4e3   :  { %v1756_v12 = vpop.eup %1755  ;;  %v709_v32 = vadd.f32 %v706_v30, %v705_v51  ;;  %v1295_v16 = vadd.f32 %v1292_v62, %v1291_v17  ;;  %v735_v55 = vrot.slane %v734_v49, 1 }
 0x4e4   :  { %v1758_v18 = vpop.eup %1757  ;;  %v1400_v27 = vpack.c.bf16 %v1756_v12, %v1754_v43  ;;  %v1294_v43 = vmul.f32 %v2162_v63, %v2278_v11  ;;  %v1066_v41 = vadd.f32 %v1065_v31, %v2411_v54  ;;  %v950_v12 = vadd.f32 %v949_v36, %v948_v14 }
 0x4e5   :  { %v1760_v28 = vpop.eup %1759  ;;  %v710_v26 = vadd.f32 %v709_v32, %v707_v52  ;;  %v736_v20 = vadd.f32 %v735_v55, %v734_v49 }
 0x4e6   :  { %1407 = vmatpush.bf16.msra.mxu2 %v1400_v27  ;;  %v1399_v44 = vpack.c.bf16 %v1760_v28, %v1758_v18  ;;  %v1197_v27 = vrot.slane %v1066_v41, 7 }
 0x4e7   :  { %v1037_v0 = vpop.permute.xlu1 %1036  ;;  %v742_v40 = vadd.f32 %v2411_v54, %v736_v20 }
 0x4e8   :  { %v1042_v38 = vmul.f32 %v1037_v0, %v2014_v21  ;;  %v703_v58 = vpop.permute.xlu0 %702 }
 0x4e9   :  { %v708_v15 = vmul.f32 %v703_v58, %v1998_v5  ;;  %v1293_v5 = vmul.f32 %v2172_v4, %v2276_v8  ;;  %v958_v34 = vrot.slane %v742_v40, 7  ;;  %v1278_v58 = vmul.f32 %v2441_v24, %v2117_v48 }
 0x4ea   :  { %v1045_v35 = vadd.f32 %v1044_v45, %v1042_v38  ;;  %1408 = vmatpush.bf16.msra.mxu2 %v1399_v44  ;;  %v1275_v44 = vpop.permute.xlu2 %1274 }
 0x4eb   :  { %v711_v1 = vadd.f32 %v710_v26, %v708_v15  ;;  %v1296_v3 = vadd.f32 %v1295_v16, %v1293_v5 }
 0x4ec   :  { %v1046_v39 = vrot.slane %v1045_v35, 4 }
 0x4ed   :  { %v712_v21 = vrot.slane %v711_v1, 4  ;;  %1650 = vmatmul.msk.bf16.vlgmr.msra.gmra.mxu2 %vm102_vm0, %v2375_v56  ;;  %v1297_v8 = vadd.f32 %v1296_v3, %v1294_v43  ;;  %v2527_v3 = vld [vmem:[#allocation6_spill] sm:$0xff] }
 0x4ee   :  { %v1047_v2 = vadd.f32 %v1046_v39, %v1045_v35  ;;  %v1280_v35 = vmul.f32 %v1275_v44, %v2111_v46 }
 0x4ef   :  { %v713_v42 = vadd.f32 %v712_v21, %v711_v1  ;;  %v1298_v11 = vrot.slane %v1297_v8, 4 }
 0x4f0   :  { %v1048_v37 = vrot.slane %v1047_v2, 2  ;;  %v2460_v19 = vpop.permute.xlu0 %953 }
 0x4f1   :  { %v714_v59 = vrot.slane %v713_v42, 2  ;;  %v956_v23 = vadd.f32 %v2460_v19, %v950_v12  ;;  %v1299_v45 = vadd.f32 %v1298_v11, %v1297_v8 }
 0x4f2   :  { %v1049_v51 = vadd.f32 %v1048_v37, %v1047_v2 }
 0x4f3   :  { %v715_v56 = vadd.f32 %v714_v59, %v713_v42  ;;  %v961_v9 = vrot.slane %v956_v23, 6  ;;  %v1300_v26 = vrot.slane %v1299_v45, 2 }
 0x4f4   :  { %v1050_v22 = vrot.slane %v1049_v51, 1 }
 0x4f5   :  { %v716_v30 = vrot.slane %v715_v56, 1  ;;  %v1301_v49 = vadd.f32 %v1300_v26, %v1299_v45 }
 0x4f6   :  { %v1051_v18 = vadd.f32 %v1050_v22, %v1049_v51 }
 0x4f7   :  { %v717_v25 = vadd.f32 %v716_v30, %v715_v56  ;;  %v1302_v39 = vrot.slane %v1301_v49, 1 }
 0x4f8   :  { %v1052_v28 = vadd.f32 %v1051_v18, %v2409_v50  ;;  %v1260_v32 = vpop.permute.xlu0 %1259 }
 0x4f9   :  { %v723_v29 = vadd.f32 %v2409_v50, %v717_v25  ;;  %v1277_v38 = vmul.f32 %v1260_v32, %v2132_v53  ;;  %v1303_v21 = vadd.f32 %v1302_v39, %v1301_v49 }
 0x4fa   :  { %v1202_v52 = vsel %vm963_vm1, %v1052_v28, %v1197_v27 }
 0x4fb   :  { %v964_v0 = vsel %vm963_vm1, %v723_v29, %v958_v34  ;;  %v1281_v15 = vadd.f32 %v1278_v58, %v1277_v38  ;;  %v1304_v60 = vadd.f32 %v1303_v21, %v2411_v54  ;;  %v2528_v54 = vld [vmem:[#allocation5_spill] sm:$0xff] }
 0x4fc   :  { %v965_v13 = vsel %vm416_vm11, %v964_v0, %v961_v9 }
 0x4fd   :  { %1442 = vst [vmem:[#allocation2] sm:$0x7] %v965_v13  ;;  %1651 = vmatmul.msk.bf16.gmra.mxu2 %vm102_vm0, %v2382_v6  ;;  %v1435_v2 = vrot.slane %v1304_v60, 7 }
 0x500   :  { %v1270_v17 = vpop.permute.xlu0 %1269 }
 0x501   :  { %v1279_v33 = vmul.f32 %v1270_v17, %v2113_v47 }
 0x503   :  { %v1282_v62 = vadd.f32 %v1281_v15, %v1279_v33 }
 0x505   :  { %v1283_v1 = vadd.f32 %v1282_v62, %v1280_v35 }
 0x507   :  { %v1284_v14 = vrot.slane %v1283_v1, 4 }
 0x509   :  { %v1285_v53 = vadd.f32 %v1284_v14, %v1283_v1 }
 0x50b   :  { %v1286_v16 = vrot.slane %v1285_v53, 2 }
 0x50d   :  { %v1287_v6 = vadd.f32 %v1286_v16, %v1285_v53 }
 0x50f   :  { %v1288_v48 = vrot.slane %v1287_v6, 1 }
 0x511   :  { %v1289_v24 = vadd.f32 %v1288_v48, %v1287_v6 }
 0x513   :  { %v1290_v5 = vadd.f32 %v1289_v24, %v2409_v50 }
 0x515   :  { %v1440_v47 = vsel %vm963_vm1, %v1290_v5, %v1435_v2 }
 0x523   :  { %v1172_v55 = vpop.f32.mrf.mxu2 }
 0x524   :  { %v1182_v36 = vmul.f32 %v1172_v55, %v2142_v57 }
 0x52b   :  { %v1174_v46 = vpop.f32.mrf.mxu2 }
 0x52c   :  { %v1183_v37 = vmul.f32 %v1174_v46, %v2156_v61 }
 0x52e   :  { %v1186_v31 = vadd.f32 %v1183_v37, %v1182_v36 }
 0x533   :  { %v1177_v42 = vpop.f32.mrf.mxu2 }
 0x534   :  { %v1184_v59 = vmul.f32 %v1177_v42, %v2527_v3 }
 0x536   :  { %v1187_v43 = vadd.f32 %v1186_v31, %v1184_v59 }
 0x53b   :  { %v1179_v51 = vpop.f32.mrf.mxu2 }
 0x53c   :  { %v1185_v20 = vmul.f32 %v1179_v51, %v2528_v54 }
 0x53e   :  { %v1188_v56 = vadd.f32 %v1187_v43, %v1185_v20 }
 0x540   :  { %v1189_v41 = vrot.slane %v1188_v56, 4 }
 0x542   :  { %v1190_v22 = vadd.f32 %v1189_v41, %v1188_v56 }
 0x544   :  { %v1191_v50 = vrot.slane %v1190_v22, 2 }
 0x546   :  { %v1192_v12 = vadd.f32 %v1191_v50, %v1190_v22 }
 0x548   :  { %v1193_v8 = vrot.slane %v1192_v12, 1 }
 0x54a   :  { %v1194_v40 = vadd.f32 %v1193_v8, %v1192_v12 }
 0x54c   :  { %v1195_v30 = vadd.f32 %v1194_v40, %v2460_v19 }
 0x54e   :  { %v1200_v18 = vrot.slane %v1195_v30, 6 }
 0x550   :  { %v1203_v61 = vsel %vm416_vm11, %v1202_v52, %v1200_v18 }
 0x551   :  { %1443 = vst [vmem:[#allocation2 + $0x4] sm:$0x7] %v1203_v61 }
 0x570   :  { %v1410_v57 = vpop.f32.mrf.mxu2 }
 0x571   :  { %v1420_v28 = vmul.f32 %v1410_v57, %v2184_v10 }
 0x578   :  { %v1412_v23 = vpop.f32.mrf.mxu2 }
 0x579   :  { %v1421_v27 = vmul.f32 %v1412_v23, %v2177_v7 }
 0x57b   :  { %v1424_v11 = vadd.f32 %v1421_v27, %v1420_v28 }
 0x580   :  { %v1415_v25 = vpop.f32.mrf.mxu2 }
 0x581   :  { %v1422_v32 = vmul.f32 %v1415_v25, %v2172_v4 }
 0x583   :  { %v1425_v29 = vadd.f32 %v1424_v11, %v1422_v32 }
 0x588   :  { %v1417_v34 = vpop.f32.mrf.mxu2 }
 0x589   :  { %v1423_v9 = vmul.f32 %v1417_v34, %v2162_v63 }
 0x58b   :  { %v1426_v0 = vadd.f32 %v1425_v29, %v1423_v9 }
 0x58d   :  { %v1427_v13 = vrot.slane %v1426_v0, 4 }
 0x58f   :  { %v1428_v45 = vadd.f32 %v1427_v13, %v1426_v0 }
 0x591   :  { %v1429_v38 = vrot.slane %v1428_v45, 2 }
 0x593   :  { %v1430_v52 = vadd.f32 %v1429_v38, %v1428_v45 }
 0x595   :  { %v1431_v58 = vrot.slane %v1430_v52, 1 }
 0x597   :  { %v1432_v44 = vadd.f32 %v1431_v58, %v1430_v52 }
 0x599   :  { %v1433_v7 = vadd.f32 %v1432_v44, %v2460_v19 }
 0x59b   :  { %v1438_v4 = vrot.slane %v1433_v7, 6 }
 0x59d   :  { %v1441_v63 = vsel %vm416_vm11, %v1440_v47, %v1438_v4 }
 0x59e   :  { %1444 = vst [vmem:[#allocation2 + $0x8] sm:$0x7] %v1441_v63 }
 0x59f   :  { %1457 = dma.vmem_to_hbm [thread:$0]  %s1450_s5, 192, %s1452_s29, [#allocation3], %s1788_s3, %s1788_s3, %s1790_s13  }
 0x5a0   :  { %1785 = dma.done.wait [#allocation3], 192  }
 0x5a1   :  { %1786 = vsyncadd [#allocation3], 4294967104 }
 0x5a2   :  { %1462 = vsyncpa [#allocation3], 1 }

</bundles_post_ra>
